<compile_context>
chip_gen: v6e
topology: v6e:2x2x1
jax: 0.10.0
libtpu: 0.0.40
codegen_flags: <defaults>
</compile_context>

<pallas_src>
import functools

import jax
import jax.numpy as jnp
from jax.experimental import pallas as pl
from jax.experimental.pallas import tpu as pltpu

BN_EPS = 1e-5

# Row offsets inside the packed weight slab (8-row aligned sections).
_ROW_W1 = 0       # conv1 taps: rows 0..1, (1,16) each (zero-padded to 32 lanes)
_OFF_W2 = 8       # conv2 [tap0; tap1] stacked: rows 8..39   (32, 32)
_OFF_W3 = 40      # conv3 [tap0; tap1] stacked: rows 40..103 (64, 32)
_OFF_WH = 104     # head weight, rows 104..103+32*l3, (l3*32, 32) (cols>=n_out are 0)


def _dqn_kernel(n, n_pad, s, x_ref, m_ref, bnv_ref, wcat_ref, out_ref):
    """Whole forward pass, fully resident in VMEM (gridless)."""
    f32 = jnp.float32
    C1, C2 = 16, 32
    l3 = s - 3
    r1 = (s - 1) * n_pad
    r2 = (s - 2) * n_pad
    r3 = (s - 3) * n_pad
    inv1 = 1.0 / ((s - 1) * n)          # true (unpadded) row counts
    inv2 = 1.0 / ((s - 2) * n)
    inv3 = 1.0 / ((s - 3) * n)

    bnv = bnv_ref[...]        # (10, 32): b1,g1,be1, b2,g2,be2, b3,g3,be3, bh
    m = m_ref[...]            # (s*n_pad, 1) validity mask (1.0 real row, 0.0 pad)

    def bn_relu(y, mk, g, be, inv_cnt):
        # Train-mode BatchNorm1d over the valid (time, batch) rows only:
        # masked mean, centered (two-pass) biased variance, affine, ReLU.
        mean = jnp.sum(y * mk, axis=0, keepdims=True) * inv_cnt
        d = (y - mean) * mk
        var = jnp.sum(d * d, axis=0, keepdims=True) * inv_cnt
        inv = jax.lax.rsqrt(var + BN_EPS)
        return jnp.maximum((y - mean) * (inv * g) + be, 0.0)

    # ---- Layer 1: Conv1d(1 -> 16, k=2) on the VPU (K=2 too shallow for MXU).
    xb = jnp.broadcast_to(x_ref[...], (s * n_pad, C1))   # hoisted lane broadcast
    w1taps = wcat_ref[_ROW_W1:_ROW_W1 + 2, :]            # (2, 32); cols 16: zero
    y = (xb[:r1, :] * w1taps[0:1, :C1]
         + xb[n_pad:, :] * w1taps[1:2, :C1]
         + bnv[0:1, :C1])
    h = bn_relu(y, m[:r1, :], bnv[1:2, :C1], bnv[2:3, :C1], inv1)    # (r1, 16)

    # ---- Layer 2: Conv1d(16 -> 32, k=2) fused into ONE (r2,32)@(32,32) matmul.
    lhs = jnp.concatenate([h[:r2, :], h[n_pad:, :]], axis=-1)        # (r2, 32)
    y = (jnp.dot(lhs, wcat_ref[_OFF_W2:_OFF_W2 + 2 * C1, :],
                 preferred_element_type=f32)
         + bnv[3:4, :])
    h = bn_relu(y, m[:r2, :], bnv[4:5, :], bnv[5:6, :], inv2)        # (r2, 32)

    # ---- Layer 3: Conv1d(32 -> 32, k=2) fused into ONE (r3,64)@(64,32) matmul.
    lhs = jnp.concatenate([h[:r3, :], h[n_pad:, :]], axis=-1)        # (r3, 64)
    y = (jnp.dot(lhs, wcat_ref[_OFF_W3:_OFF_W3 + 2 * C2, :],
                 preferred_element_type=f32)
         + bnv[6:7, :])
    h = bn_relu(y, m[:r3, :], bnv[7:8, :], bnv[8:9, :], inv3)        # (r3, 32)

    # ---- Head: Linear(32*l3 -> n_out) as ONE (n_pad, l3*32)@(l3*32, 32) matmul.
    # Reorder time-major -> batch-major with aligned (n_pad,32) slices + lane concat.
    flat = jnp.concatenate(
        [h[t * n_pad:(t + 1) * n_pad, :] for t in range(l3)], axis=-1)
    out_ref[...] = (jnp.dot(flat, wcat_ref[_OFF_WH:_OFF_WH + l3 * C2, :],
                            preferred_element_type=f32)
                    + bnv[9:10, :])                                  # (n_pad, 32)


def pack_kernel_params(W1, b1, g1, be1, W2, b2, g2, be2, W3, b3, g3, be3,
                       Wh, bh, s, n_out):
    """Pack the 17 PyTorch-shaped parameters into two lane-uniform f32 slabs."""
    l3 = s - 3

    def row32(v):
        v = jnp.asarray(v, jnp.float32).reshape(1, -1)
        return jnp.pad(v, ((0, 0), (0, 32 - v.shape[1])))

    bnv = jnp.concatenate(
        [row32(b1), row32(g1), row32(be1),
         row32(b2), row32(g2), row32(be2),
         row32(b3), row32(g3), row32(be3),
         row32(bh)], axis=0)                                        # (10, 32)

    def pad_cols32(w):
        w = jnp.asarray(w, jnp.float32)
        return jnp.pad(w, ((0, 0), (0, 32 - w.shape[1])))

    # Head weight permuted to row index = t*32 + c (PyTorch flatten of the
    # (N, C, L) activation has column index c*l3 + t).
    whk = Wh.reshape(n_out, 32, l3).transpose(2, 1, 0).reshape(l3 * 32, n_out)

    wcat = jnp.concatenate([
        pad_cols32(W1[:, :, 0].T),                 # row 0   (1, 32)
        pad_cols32(W1[:, :, 1].T),                 # row 1
        jnp.zeros((6, 32), jnp.float32),           # rows 2..7  (8-row alignment)
        jnp.asarray(W2[:, :, 0].T, jnp.float32),   # rows 8..23   } fused K=32
        jnp.asarray(W2[:, :, 1].T, jnp.float32),   # rows 24..39  }
        jnp.asarray(W3[:, :, 0].T, jnp.float32),   # rows 40..71  } fused K=64
        jnp.asarray(W3[:, :, 1].T, jnp.float32),   # rows 72..103 }
        pad_cols32(whk),                           # rows 104..103 + 32*l3
    ], axis=0)                                     # (104 + 32*l3, 32)
    return bnv, wcat


def dqn_forward(x_ncw, bnv, wcat, n_out):
    """x_ncw: (N, 1, s) float32, PyTorch NCW layout."""
    N, c_in, s = x_ncw.shape
    assert c_in == 1
    l3 = s - 3
    n_pad = ((N + 7) // 8) * 8          # sublane-aligned row stride for shifts

    # Time-major, batch-minor rows: row = t*n_pad + i.  Padded batch rows are
    # zero and excluded from BN statistics via the mask column.
    xt = jnp.pad(x_ncw[:, 0, :].T.astype(jnp.float32),
                 ((0, 0), (0, n_pad - N)))                      # (s, n_pad)
    x_tm = xt.reshape(s * n_pad, 1)
    mask = jnp.tile((jnp.arange(n_pad) < N).astype(jnp.float32),
                    s).reshape(s * n_pad, 1)

    r1, r2, r3 = (s - 1) * n_pad, (s - 2) * n_pad, (s - 3) * n_pad
    flops = int(4 * r1 * 16                 # layer-1 VPU conv
                + 2 * r2 * 32 * 32          # fused layer-2 matmul
                + 2 * r3 * 64 * 32          # fused layer-3 matmul
                + 2 * n_pad * (l3 * 32) * 32)   # single head matmul
    bytes_accessed = int((x_tm.size + mask.size + bnv.size + wcat.size
                          + n_pad * 32) * 4)

    vmem = pl.BlockSpec(memory_space=pltpu.MemorySpace.VMEM)
    out = pl.pallas_call(
        functools.partial(_dqn_kernel, N, n_pad, s),
        out_shape=jax.ShapeDtypeStruct((n_pad, 32), jnp.float32),
        in_specs=[vmem, vmem, vmem, vmem],
        out_specs=vmem,
        compiler_params=pltpu.CompilerParams(vmem_limit_bytes=4 * 1024 * 1024),
        cost_estimate=pl.CostEstimate(flops=flops, transcendentals=96,
                                      bytes_accessed=bytes_accessed),
    )(x_tm, mask, bnv, wcat)
    return out[:N, :n_out]                  # lane-dense store, slice outside


# ----------------------------------------------------------------------------
# Pure-JAX reference matching the PyTorch module (NCW layout, train-mode BN).
# ----------------------------------------------------------------------------
def _reference_forward(x, W1, b1, g1, be1, W2, b2, g2, be2, W3, b3, g3, be3,
                       Wh, bh):
    def conv1d_k2(h, W, b):
        y = (jnp.einsum("ncl,oc->nol", h[:, :, :-1], W[:, :, 0])
             + jnp.einsum("ncl,oc->nol", h[:, :, 1:], W[:, :, 1]))
        return y + b[None, :, None]

    def bn_relu(h, g, be):
        mean = jnp.mean(h, axis=(0, 2), keepdims=True)
        var = jnp.mean((h - mean) ** 2, axis=(0, 2), keepdims=True)
        h = (h - mean) * jax.lax.rsqrt(var + BN_EPS)
        h = h * g[None, :, None] + be[None, :, None]
        return jnp.maximum(h, 0.0)

    h = bn_relu(conv1d_k2(x, W1, b1), g1, be1)
    h = bn_relu(conv1d_k2(h, W2, b2), g2, be2)
    h = bn_relu(conv1d_k2(h, W3, b3), g3, be3)
    flat = h.reshape(h.shape[0], -1)            # torch .view(N, -1) on (N, C, L)
    return flat @ Wh.T + bh


def _make_params(key, s, n_out):
    l3 = s - 3
    ks = jax.random.split(key, 16)

    def rnd(k, shape, scale=0.1):
        return scale * jax.random.normal(k, shape, dtype=jnp.float32)

    W1 = rnd(ks[0], (16, 1, 2));  b1 = rnd(ks[1], (16,))
    W2 = rnd(ks[2], (32, 16, 2)); b2 = rnd(ks[3], (32,))
    W3 = rnd(ks[4], (32, 32, 2)); b3 = rnd(ks[5], (32,))
    g1 = 1.0 + rnd(ks[6], (16,)); be1 = rnd(ks[7], (16,))
    g2 = 1.0 + rnd(ks[8], (32,)); be2 = rnd(ks[9], (32,))
    g3 = 1.0 + rnd(ks[10], (32,)); be3 = rnd(ks[11], (32,))
    Wh = rnd(ks[12], (n_out, 32 * l3)); bh = rnd(ks[13], (n_out,))

    torch_params = (W1, b1, g1, be1, W2, b2, g2, be2, W3, b3, g3, be3, Wh, bh)
    bnv, wcat = pack_kernel_params(W1, b1, g1, be1, W2, b2, g2, be2,
                                   W3, b3, g3, be3, Wh, bh, s, n_out)
    return torch_params, bnv, wcat


if __name__ == "__main__":
    N, S, N_OUT = 2, 16, 4          # batch=2, s=16, outputs=4
    key = jax.random.PRNGKey(0)
    k_x, k_p = jax.random.split(key)

    x = jax.random.normal(k_x, (N, 1, S), dtype=jnp.float32)   # NCW, like PyTorch
    torch_params, bnv, wcat = _make_params(k_p, S, N_OUT)

    out = dqn_forward(x, bnv, wcat, N_OUT)
    out = jax.block_until_ready(out)

    ref = _reference_forward(x, *torch_params)
    assert out.shape == (N, N_OUT)
    assert jnp.allclose(out, ref, rtol=1e-4, atol=1e-4), (out, ref)

    print("KERNEL_OK")
</pallas_src>

<mosaic_0001>
module attributes {stable_mosaic.version = 11 : i64} {
  func.func @_dqn_kernel(%arg0: memref<128x1xf32, #tpu.memory_space<vmem>>, %arg1: memref<128x1xf32, #tpu.memory_space<vmem>>, %arg2: memref<10x32xf32, #tpu.memory_space<vmem>>, %arg3: memref<520x32xf32, #tpu.memory_space<vmem>>, %arg4: memref<8x32xf32, #tpu.memory_space<vmem>>) attributes {dimension_semantics = [], scalar_prefetch = 0 : i64, scratch_operands = 0 : i64, tpu.core_type = #tpu.core_type<tc>} {
    %c0 = arith.constant 0 : index
    %c0_0 = arith.constant 0 : index
    %0 = vector.load %arg2[%c0, %c0_0] : memref<10x32xf32, #tpu.memory_space<vmem>>, vector<10x32xf32>
    %c0_1 = arith.constant 0 : index
    %c0_2 = arith.constant 0 : index
    %1 = vector.load %arg1[%c0_1, %c0_2] : memref<128x1xf32, #tpu.memory_space<vmem>>, vector<128x1xf32>
    %c0_3 = arith.constant 0 : index
    %c0_4 = arith.constant 0 : index
    %2 = vector.load %arg0[%c0_3, %c0_4] : memref<128x1xf32, #tpu.memory_space<vmem>>, vector<128x1xf32>
    %3 = vector.shape_cast %2 : vector<128x1xf32> to vector<128x1xf32>
    %4 = vector.broadcast %3 : vector<128x1xf32> to vector<128x16xf32>
    %c0_5 = arith.constant 0 : index
    %c0_6 = arith.constant 0 : index
    %5 = vector.load %arg3[%c0_5, %c0_6] : memref<520x32xf32, #tpu.memory_space<vmem>>, vector<2x32xf32>
    %6 = vector.extract_strided_slice %4 {offsets = [0, 0], sizes = [120, 16], strides = [1, 1]} : vector<128x16xf32> to vector<120x16xf32>
    %7 = vector.extract_strided_slice %5 {offsets = [0, 0], sizes = [1, 16], strides = [1, 1]} : vector<2x32xf32> to vector<1x16xf32>
    %8 = vector.broadcast %7 : vector<1x16xf32> to vector<120x16xf32>
    %9 = arith.mulf %6, %8 : vector<120x16xf32>
    %10 = vector.extract_strided_slice %4 {offsets = [8, 0], sizes = [120, 16], strides = [1, 1]} : vector<128x16xf32> to vector<120x16xf32>
    %11 = vector.extract_strided_slice %5 {offsets = [1, 0], sizes = [1, 16], strides = [1, 1]} : vector<2x32xf32> to vector<1x16xf32>
    %12 = vector.broadcast %11 : vector<1x16xf32> to vector<120x16xf32>
    %13 = arith.mulf %10, %12 : vector<120x16xf32>
    %14 = arith.addf %9, %13 : vector<120x16xf32>
    %15 = vector.extract_strided_slice %0 {offsets = [0, 0], sizes = [1, 16], strides = [1, 1]} : vector<10x32xf32> to vector<1x16xf32>
    %16 = vector.broadcast %15 : vector<1x16xf32> to vector<120x16xf32>
    %17 = arith.addf %14, %16 : vector<120x16xf32>
    %18 = vector.extract_strided_slice %1 {offsets = [0, 0], sizes = [120, 1], strides = [1, 1]} : vector<128x1xf32> to vector<120x1xf32>
    %19 = vector.extract_strided_slice %0 {offsets = [1, 0], sizes = [1, 16], strides = [1, 1]} : vector<10x32xf32> to vector<1x16xf32>
    %20 = vector.extract_strided_slice %0 {offsets = [2, 0], sizes = [1, 16], strides = [1, 1]} : vector<10x32xf32> to vector<1x16xf32>
    %21 = vector.broadcast %18 : vector<120x1xf32> to vector<120x16xf32>
    %22 = arith.mulf %17, %21 : vector<120x16xf32>
    %cst = arith.constant dense<0.000000e+00> : vector<16xf32>
    %23 = vector.multi_reduction <add>, %22, %cst [0] : vector<120x16xf32> to vector<16xf32>
    %24 = vector.shape_cast %23 : vector<16xf32> to vector<1x16xf32>
    %cst_7 = arith.constant 0.0333333351 : f32
    %25 = vector.broadcast %cst_7 : f32 to vector<1x16xf32>
    %26 = arith.mulf %24, %25 : vector<1x16xf32>
    %27 = vector.broadcast %26 : vector<1x16xf32> to vector<120x16xf32>
    %28 = arith.subf %17, %27 : vector<120x16xf32>
    %29 = vector.broadcast %18 : vector<120x1xf32> to vector<120x16xf32>
    %30 = arith.mulf %28, %29 : vector<120x16xf32>
    %31 = arith.mulf %30, %30 : vector<120x16xf32>
    %cst_8 = arith.constant dense<0.000000e+00> : vector<16xf32>
    %32 = vector.multi_reduction <add>, %31, %cst_8 [0] : vector<120x16xf32> to vector<16xf32>
    %33 = vector.shape_cast %32 : vector<16xf32> to vector<1x16xf32>
    %cst_9 = arith.constant 0.0333333351 : f32
    %34 = vector.broadcast %cst_9 : f32 to vector<1x16xf32>
    %35 = arith.mulf %33, %34 : vector<1x16xf32>
    %cst_10 = arith.constant 9.99999974E-6 : f32
    %36 = vector.broadcast %cst_10 : f32 to vector<1x16xf32>
    %37 = arith.addf %35, %36 : vector<1x16xf32>
    %38 = math.rsqrt %37 : vector<1x16xf32>
    %39 = vector.broadcast %26 : vector<1x16xf32> to vector<120x16xf32>
    %40 = arith.subf %17, %39 : vector<120x16xf32>
    %41 = arith.mulf %38, %19 : vector<1x16xf32>
    %42 = vector.broadcast %41 : vector<1x16xf32> to vector<120x16xf32>
    %43 = arith.mulf %40, %42 : vector<120x16xf32>
    %44 = vector.broadcast %20 : vector<1x16xf32> to vector<120x16xf32>
    %45 = arith.addf %43, %44 : vector<120x16xf32>
    %cst_11 = arith.constant 0.000000e+00 : f32
    %46 = vector.broadcast %cst_11 : f32 to vector<120x16xf32>
    %47 = arith.maximumf %45, %46 : vector<120x16xf32>
    %48 = vector.extract_strided_slice %47 {offsets = [0, 0], sizes = [112, 16], strides = [1, 1]} : vector<120x16xf32> to vector<112x16xf32>
    %49 = vector.extract_strided_slice %47 {offsets = [8, 0], sizes = [112, 16], strides = [1, 1]} : vector<120x16xf32> to vector<112x16xf32>
    %50 = tpu.concatenate %48, %49 in 1 : vector<112x16xf32>, vector<112x16xf32> -> vector<112x32xf32>
    %c8 = arith.constant 8 : index
    %c0_12 = arith.constant 0 : index
    %51 = vector.load %arg3[%c8, %c0_12] : memref<520x32xf32, #tpu.memory_space<vmem>>, vector<32x32xf32>
    %cst_13 = arith.constant dense<0.000000e+00> : vector<112x32xf32>
    %52 = tpu.matmul %50, %51, %cst_13 {dimension_numbers = #tpu.dot_dimension_numbers<[1], [0], [0], [1], [0, 0, 1, 1], [], []>} : vector<112x32xf32>, vector<32x32xf32>, vector<112x32xf32> -> vector<112x32xf32>
    %53 = vector.extract_strided_slice %0 {offsets = [3, 0], sizes = [1, 32], strides = [1, 1]} : vector<10x32xf32> to vector<1x32xf32>
    %54 = vector.broadcast %53 : vector<1x32xf32> to vector<112x32xf32>
    %55 = arith.addf %52, %54 : vector<112x32xf32>
    %56 = vector.extract_strided_slice %1 {offsets = [0, 0], sizes = [112, 1], strides = [1, 1]} : vector<128x1xf32> to vector<112x1xf32>
    %57 = vector.extract_strided_slice %0 {offsets = [4, 0], sizes = [1, 32], strides = [1, 1]} : vector<10x32xf32> to vector<1x32xf32>
    %58 = vector.extract_strided_slice %0 {offsets = [5, 0], sizes = [1, 32], strides = [1, 1]} : vector<10x32xf32> to vector<1x32xf32>
    %59 = vector.broadcast %56 : vector<112x1xf32> to vector<112x32xf32>
    %60 = arith.mulf %55, %59 : vector<112x32xf32>
    %cst_14 = arith.constant dense<0.000000e+00> : vector<32xf32>
    %61 = vector.multi_reduction <add>, %60, %cst_14 [0] : vector<112x32xf32> to vector<32xf32>
    %62 = vector.shape_cast %61 : vector<32xf32> to vector<1x32xf32>
    %cst_15 = arith.constant 0.0357142873 : f32
    %63 = vector.broadcast %cst_15 : f32 to vector<1x32xf32>
    %64 = arith.mulf %62, %63 : vector<1x32xf32>
    %65 = vector.broadcast %64 : vector<1x32xf32> to vector<112x32xf32>
    %66 = arith.subf %55, %65 : vector<112x32xf32>
    %67 = vector.broadcast %56 : vector<112x1xf32> to vector<112x32xf32>
    %68 = arith.mulf %66, %67 : vector<112x32xf32>
    %69 = arith.mulf %68, %68 : vector<112x32xf32>
    %cst_16 = arith.constant dense<0.000000e+00> : vector<32xf32>
    %70 = vector.multi_reduction <add>, %69, %cst_16 [0] : vector<112x32xf32> to vector<32xf32>
    %71 = vector.shape_cast %70 : vector<32xf32> to vector<1x32xf32>
    %cst_17 = arith.constant 0.0357142873 : f32
    %72 = vector.broadcast %cst_17 : f32 to vector<1x32xf32>
    %73 = arith.mulf %71, %72 : vector<1x32xf32>
    %cst_18 = arith.constant 9.99999974E-6 : f32
    %74 = vector.broadcast %cst_18 : f32 to vector<1x32xf32>
    %75 = arith.addf %73, %74 : vector<1x32xf32>
    %76 = math.rsqrt %75 : vector<1x32xf32>
    %77 = vector.broadcast %64 : vector<1x32xf32> to vector<112x32xf32>
    %78 = arith.subf %55, %77 : vector<112x32xf32>
    %79 = arith.mulf %76, %57 : vector<1x32xf32>
    %80 = vector.broadcast %79 : vector<1x32xf32> to vector<112x32xf32>
    %81 = arith.mulf %78, %80 : vector<112x32xf32>
    %82 = vector.broadcast %58 : vector<1x32xf32> to vector<112x32xf32>
    %83 = arith.addf %81, %82 : vector<112x32xf32>
    %cst_19 = arith.constant 0.000000e+00 : f32
    %84 = vector.broadcast %cst_19 : f32 to vector<112x32xf32>
    %85 = arith.maximumf %83, %84 : vector<112x32xf32>
    %86 = vector.extract_strided_slice %85 {offsets = [0, 0], sizes = [104, 32], strides = [1, 1]} : vector<112x32xf32> to vector<104x32xf32>
    %87 = vector.extract_strided_slice %85 {offsets = [8, 0], sizes = [104, 32], strides = [1, 1]} : vector<112x32xf32> to vector<104x32xf32>
    %88 = tpu.concatenate %86, %87 in 1 : vector<104x32xf32>, vector<104x32xf32> -> vector<104x64xf32>
    %c40 = arith.constant 40 : index
    %c0_20 = arith.constant 0 : index
    %89 = vector.load %arg3[%c40, %c0_20] : memref<520x32xf32, #tpu.memory_space<vmem>>, vector<64x32xf32>
    %cst_21 = arith.constant dense<0.000000e+00> : vector<104x32xf32>
    %90 = tpu.matmul %88, %89, %cst_21 {dimension_numbers = #tpu.dot_dimension_numbers<[1], [0], [0], [1], [0, 0, 1, 1], [], []>} : vector<104x64xf32>, vector<64x32xf32>, vector<104x32xf32> -> vector<104x32xf32>
    %91 = vector.extract_strided_slice %0 {offsets = [6, 0], sizes = [1, 32], strides = [1, 1]} : vector<10x32xf32> to vector<1x32xf32>
    %92 = vector.broadcast %91 : vector<1x32xf32> to vector<104x32xf32>
    %93 = arith.addf %90, %92 : vector<104x32xf32>
    %94 = vector.extract_strided_slice %1 {offsets = [0, 0], sizes = [104, 1], strides = [1, 1]} : vector<128x1xf32> to vector<104x1xf32>
    %95 = vector.extract_strided_slice %0 {offsets = [7, 0], sizes = [1, 32], strides = [1, 1]} : vector<10x32xf32> to vector<1x32xf32>
    %96 = vector.extract_strided_slice %0 {offsets = [8, 0], sizes = [1, 32], strides = [1, 1]} : vector<10x32xf32> to vector<1x32xf32>
    %97 = vector.broadcast %94 : vector<104x1xf32> to vector<104x32xf32>
    %98 = arith.mulf %93, %97 : vector<104x32xf32>
    %cst_22 = arith.constant dense<0.000000e+00> : vector<32xf32>
    %99 = vector.multi_reduction <add>, %98, %cst_22 [0] : vector<104x32xf32> to vector<32xf32>
    %100 = vector.shape_cast %99 : vector<32xf32> to vector<1x32xf32>
    %cst_23 = arith.constant 0.0384615399 : f32
    %101 = vector.broadcast %cst_23 : f32 to vector<1x32xf32>
    %102 = arith.mulf %100, %101 : vector<1x32xf32>
    %103 = vector.broadcast %102 : vector<1x32xf32> to vector<104x32xf32>
    %104 = arith.subf %93, %103 : vector<104x32xf32>
    %105 = vector.broadcast %94 : vector<104x1xf32> to vector<104x32xf32>
    %106 = arith.mulf %104, %105 : vector<104x32xf32>
    %107 = arith.mulf %106, %106 : vector<104x32xf32>
    %cst_24 = arith.constant dense<0.000000e+00> : vector<32xf32>
    %108 = vector.multi_reduction <add>, %107, %cst_24 [0] : vector<104x32xf32> to vector<32xf32>
    %109 = vector.shape_cast %108 : vector<32xf32> to vector<1x32xf32>
    %cst_25 = arith.constant 0.0384615399 : f32
    %110 = vector.broadcast %cst_25 : f32 to vector<1x32xf32>
    %111 = arith.mulf %109, %110 : vector<1x32xf32>
    %cst_26 = arith.constant 9.99999974E-6 : f32
    %112 = vector.broadcast %cst_26 : f32 to vector<1x32xf32>
    %113 = arith.addf %111, %112 : vector<1x32xf32>
    %114 = math.rsqrt %113 : vector<1x32xf32>
    %115 = vector.broadcast %102 : vector<1x32xf32> to vector<104x32xf32>
    %116 = arith.subf %93, %115 : vector<104x32xf32>
    %117 = arith.mulf %114, %95 : vector<1x32xf32>
    %118 = vector.broadcast %117 : vector<1x32xf32> to vector<104x32xf32>
    %119 = arith.mulf %116, %118 : vector<104x32xf32>
    %120 = vector.broadcast %96 : vector<1x32xf32> to vector<104x32xf32>
    %121 = arith.addf %119, %120 : vector<104x32xf32>
    %cst_27 = arith.constant 0.000000e+00 : f32
    %122 = vector.broadcast %cst_27 : f32 to vector<104x32xf32>
    %123 = arith.maximumf %121, %122 : vector<104x32xf32>
    %124 = vector.extract_strided_slice %123 {offsets = [0, 0], sizes = [8, 32], strides = [1, 1]} : vector<104x32xf32> to vector<8x32xf32>
    %125 = vector.extract_strided_slice %123 {offsets = [8, 0], sizes = [8, 32], strides = [1, 1]} : vector<104x32xf32> to vector<8x32xf32>
    %126 = vector.extract_strided_slice %123 {offsets = [16, 0], sizes = [8, 32], strides = [1, 1]} : vector<104x32xf32> to vector<8x32xf32>
    %127 = vector.extract_strided_slice %123 {offsets = [24, 0], sizes = [8, 32], strides = [1, 1]} : vector<104x32xf32> to vector<8x32xf32>
    %128 = vector.extract_strided_slice %123 {offsets = [32, 0], sizes = [8, 32], strides = [1, 1]} : vector<104x32xf32> to vector<8x32xf32>
    %129 = vector.extract_strided_slice %123 {offsets = [40, 0], sizes = [8, 32], strides = [1, 1]} : vector<104x32xf32> to vector<8x32xf32>
    %130 = vector.extract_strided_slice %123 {offsets = [48, 0], sizes = [8, 32], strides = [1, 1]} : vector<104x32xf32> to vector<8x32xf32>
    %131 = vector.extract_strided_slice %123 {offsets = [56, 0], sizes = [8, 32], strides = [1, 1]} : vector<104x32xf32> to vector<8x32xf32>
    %132 = vector.extract_strided_slice %123 {offsets = [64, 0], sizes = [8, 32], strides = [1, 1]} : vector<104x32xf32> to vector<8x32xf32>
    %133 = vector.extract_strided_slice %123 {offsets = [72, 0], sizes = [8, 32], strides = [1, 1]} : vector<104x32xf32> to vector<8x32xf32>
    %134 = vector.extract_strided_slice %123 {offsets = [80, 0], sizes = [8, 32], strides = [1, 1]} : vector<104x32xf32> to vector<8x32xf32>
    %135 = vector.extract_strided_slice %123 {offsets = [88, 0], sizes = [8, 32], strides = [1, 1]} : vector<104x32xf32> to vector<8x32xf32>
    %136 = vector.extract_strided_slice %123 {offsets = [96, 0], sizes = [8, 32], strides = [1, 1]} : vector<104x32xf32> to vector<8x32xf32>
    %137 = tpu.concatenate %124, %125, %126, %127, %128, %129, %130, %131, %132, %133, %134, %135, %136 in 1 : vector<8x32xf32>, vector<8x32xf32>, vector<8x32xf32>, vector<8x32xf32>, vector<8x32xf32>, vector<8x32xf32>, vector<8x32xf32>, vector<8x32xf32>, vector<8x32xf32>, vector<8x32xf32>, vector<8x32xf32>, vector<8x32xf32>, vector<8x32xf32> -> vector<8x416xf32>
    %c104 = arith.constant 104 : index
    %c0_28 = arith.constant 0 : index
    %138 = vector.load %arg3[%c104, %c0_28] : memref<520x32xf32, #tpu.memory_space<vmem>>, vector<416x32xf32>
    %cst_29 = arith.constant dense<0.000000e+00> : vector<8x32xf32>
    %139 = tpu.matmul %137, %138, %cst_29 {dimension_numbers = #tpu.dot_dimension_numbers<[1], [0], [0], [1], [0, 0, 1, 1], [], []>} : vector<8x416xf32>, vector<416x32xf32>, vector<8x32xf32> -> vector<8x32xf32>
    %140 = vector.extract_strided_slice %0 {offsets = [9, 0], sizes = [1, 32], strides = [1, 1]} : vector<10x32xf32> to vector<1x32xf32>
    %141 = vector.broadcast %140 : vector<1x32xf32> to vector<8x32xf32>
    %142 = arith.addf %139, %141 : vector<8x32xf32>
    %c0_30 = arith.constant 0 : index
    %c0_31 = arith.constant 0 : index
    %143 = vector.load %arg4[%c0_30, %c0_31] : memref<8x32xf32, #tpu.memory_space<vmem>>, vector<8x32xf32>
    tpu.vector_store %arg4[%c0_30, %c0_31], %142 {strides = array<i32>} : memref<8x32xf32, #tpu.memory_space<vmem>>, vector<8x32xf32>,
    return
  }
}

</mosaic_0001>

<bundles_post_ra>
// kernel: tpu_custom_call.1
= control target key start
LH: loop header
LB: loop body
LE: loop exit
PB: predicated region body
PF: predicated region fallthrough
CT: control target
= control target key end

     0   :  { %v1814_v2 = vmov 0   ;;  %s3004_s0 = inlined_call_operand.vmem [shape: f32[128,1], index: 0, kind: input, shape index: {}]   ;;  %s3005_s1 = inlined_call_operand.vmem [shape: f32[128,1], index: 1, kind: input, shape index: {}]   ;;  %s3006_s2 = inlined_call_operand.vmem [shape: f32[10,32], index: 2, kind: input, shape index: {}]   ;;  %s3007_s3 = inlined_call_operand.vmem [shape: f32[520,32], index: 3, kind: input, shape index: {}]   ;;  %s3008_s4 = inlined_call_operand.hbm [shape: f32[8,32], index: 4, kind: output, shape index: {}]  }
   0x1   :  { %v37_v0 = vld [vmem:[%s3004_s0 + $0x10] sm:$0xff]  ;;  %v35_v1 = vld [vmem:[%s3004_s0] sm:$0xff]  ;;  %1769 = vset.pattern.permute.xlu1 %v1814_v2  ;;  %1768 = vset.pattern.permute.xlu0 %v1814_v2  ;;  %v38_v3 = vld [vmem:[%s3004_s0 + $0x18] sm:$0xff] }
   0x2   :  { %64 = vperm.xlu1 %1769, %v37_v0   ;;  %54 = vperm.xlu0 %1768, %v35_v1   ;;  %v36_v4 = vld [vmem:[%s3004_s0 + $0x8] sm:$0xff]  ;;  %v39_v6 = vld [vmem:[%s3004_s0 + $0x20] sm:$0xff] }
   0x3   :  { %v40_v5 = vld [vmem:[%s3004_s0 + $0x28] sm:$0xff]  ;;  %v20_v8 = vld [vmem:[%s3005_s1] sm:$0xff] }
   0x4   :  { %v21_v7 = vld [vmem:[%s3005_s1 + $0x8] sm:$0xff] }
   0x6   :  { %69 = vperm.xlu1 %1769, %v38_v3   ;;  %59 = vperm.xlu0 %1768, %v36_v4  }
   0xa   :  { %79 = vperm.xlu1 %1769, %v40_v5   ;;  %74 = vperm.xlu0 %1768, %v39_v6  }
   0xb   :  { %9 = vsyncpa [#allocation3], 0  ;;  %v22_v9 = vld [vmem:[%s3005_s1 + $0x10] sm:$0xff]  ;;  %v23_v11 = vld [vmem:[%s3005_s1 + $0x18] sm:$0xff]  ;;  %v127_v36 = vlaneseq  ;;  %vm294_vm0 = vcmask 130048   ;;  %s1815_s9 = smov 16  }
   0xc   :  { %v41_v10 = vld [vmem:[%s3004_s0 + $0x30] sm:$0xff]  ;;  %v42_v12 = vld [vmem:[%s3004_s0 + $0x38] sm:$0xff]  ;;  %v24_v13 = vld [vmem:[%s3005_s1 + $0x20] sm:$0xff]  ;;  %vm546_vm1 = vcmask 261120   ;;  %vm1817_vm2 = vmmov 0   ;;  %s1818_s26 = smov 32  }
   0xd   :  { %v43_v14 = vld [vmem:[%s3004_s0 + $0x40] sm:$0xff]  ;;  %v25_v15 = vld [vmem:[%s3005_s1 + $0x28] sm:$0xff]  ;;  %v26_v17 = vld [vmem:[%s3005_s1 + $0x30] sm:$0xff]  ;;  %v1940_v39 = vshrl.u32 %v127_v36, 7  ;;  %vm978_vm3 = vcmask 523264   ;;  %s1819_s23 = smov 64  }
   0xe   :  { %211 = vperm.xlu1 %1769, %v21_v7   ;;  %206 = vperm.xlu0 %1768, %v20_v8   ;;  %v44_v16 = vld [vmem:[%s3004_s0 + $0x48] sm:$0xff]  ;;  %v45_v18 = vld [vmem:[%s3004_s0 + $0x50] sm:$0xff]  ;;  %v27_v19 = vld [vmem:[%s3005_s1 + $0x38] sm:$0xff]  ;;  %vm1352_vm4 = vcmask 785408  }
   0xf   :  { %v46_v20 = vld [vmem:[%s3004_s0 + $0x58] sm:$0xff]  ;;  %v28_v21 = vld [vmem:[%s3005_s1 + $0x40] sm:$0xff]  ;;  %v29_v23 = vld [vmem:[%s3005_s1 + $0x48] sm:$0xff]  ;;  %v1947_v42 = vsub.s32 0, %v1940_v39  ;;  %v1950_v43 = vsub.s32 1, %v1940_v39 }
  0x10   :  { %v47_v22 = vld [vmem:[%s3004_s0 + $0x60] sm:$0xff]  ;;  %v48_v24 = vld [vmem:[%s3004_s0 + $0x68] sm:$0xff]  ;;  %v30_v25 = vld [vmem:[%s3005_s1 + $0x50] sm:$0xff] }
  0x11   :  { %v49_v26 = vld [vmem:[%s3004_s0 + $0x70] sm:$0xff]  ;;  %v31_v27 = vld [vmem:[%s3005_s1 + $0x58] sm:$0xff]  ;;  %v33_v29 = vld [vmem:[%s3005_s1 + $0x68] sm:$0xff] }
  0x12   :  { %216 = vperm.xlu1 %1769, %v22_v9   ;;  %84 = vperm.xlu0 %1768, %v41_v10   ;;  %v50_v28 = vld [vmem:[%s3004_s0 + $0x78] sm:$0xff]  ;;  %v32_v30 = vld [vmem:[%s3005_s1 + $0x60] sm:$0xff]  ;;  %v34_v31 = vld [vmem:[%s3005_s1 + $0x70] sm:$0xff]  ;;  %s1820_s1 = smov 96  }
  0x13   :  { %v51_v44 = vld [vmem:[%s3007_s3] sm:$0x3] }
  0x14   :  { %v1958_v47 = vrot.slane %v51_v44, %v1947_v42  ;;  %v1961_v48 = vrot.slane %v51_v44, %v1950_v43  ;;  %v1970_v53 = vld [vmem:[%s3006_s2] sm:$0xff] }
  0x15   :  { %v1981_v61 = vrot.slane %v1970_v53, %v1947_v42 }
  0x16   :  { %221 = vperm.xlu1 %1769, %v23_v11   ;;  %89 = vperm.xlu0 %1768, %v42_v12  }
  0x1a   :  { %226 = vperm.xlu1 %1769, %v24_v13   ;;  %94 = vperm.xlu0 %1768, %v43_v14  }
  0x1e   :  { %231 = vperm.xlu1 %1769, %v25_v15   ;;  %99 = vperm.xlu0 %1768, %v44_v16  }
  0x22   :  { %236 = vperm.xlu1 %1769, %v26_v17   ;;  %104 = vperm.xlu0 %1768, %v45_v18  }
  0x26   :  { %241 = vperm.xlu1 %1769, %v27_v19   ;;  %109 = vperm.xlu0 %1768, %v46_v20  }
  0x2a   :  { %246 = vperm.xlu1 %1769, %v28_v21   ;;  %114 = vperm.xlu0 %1768, %v47_v22  }
  0x2e   :  { %251 = vperm.xlu1 %1769, %v29_v23   ;;  %119 = vperm.xlu0 %1768, %v48_v24  }
  0x32   :  { %256 = vperm.xlu1 %1769, %v30_v25   ;;  %124 = vperm.xlu0 %1768, %v49_v26  }
  0x36   :  { %261 = vperm.xlu1 %1769, %v31_v27   ;;  %148 = vperm.xlu0 %1768, %v50_v28  }
  0x3a   :  { %271 = vperm.xlu1 %1769, %v33_v29   ;;  %266 = vperm.xlu0 %1768, %v32_v30  }
  0x3e   :  { %276 = vperm.xlu0 %1768, %v34_v31  }
  0x7d   :  { %v65_v32 = vpop.permute.xlu1 %64  ;;  %v55_v33 = vpop.permute.xlu0 %54 }
  0x7e   :  { %v156_v55 = vmul.f32 %v1961_v48, %v65_v32  ;;  %v131_v56 = vmul.f32 %v1958_v47, %v55_v33  ;;  %v133_v57 = vmul.f32 %v1958_v47, %v65_v32 }
  0x81   :  { %v70_v34 = vpop.permute.xlu1 %69  ;;  %v60_v35 = vpop.permute.xlu0 %59 }
  0x82   :  { %v132_v51 = vmul.f32 %v1958_v47, %v60_v35  ;;  %v155_v52 = vmul.f32 %v1961_v48, %v60_v35  ;;  %v157_v54 = vmul.f32 %v1961_v48, %v70_v34  ;;  %v134_v0 = vmul.f32 %v1958_v47, %v70_v34 }
  0x84   :  { %v170_v62 = vadd.f32 %v155_v52, %v131_v56  ;;  %v171_v63 = vadd.f32 %v156_v55, %v132_v51  ;;  %v172_v1 = vadd.f32 %v157_v54, %v133_v57 }
  0x85   :  { %v80_v37 = vpop.permute.xlu1 %79  ;;  %v75_v38 = vpop.permute.xlu0 %74 }
  0x86   :  { %v158_v58 = vmul.f32 %v1961_v48, %v75_v38  ;;  %v159_v2 = vmul.f32 %v1961_v48, %v80_v37  ;;  %v135_v3 = vmul.f32 %v1958_v47, %v75_v38  ;;  %v1989_v7 = vadd.f32 %v1981_v61, %v170_v62 }
  0x87   :  { %v1992_v8 = vadd.f32 %v1981_v61, %v171_v63  ;;  %v1996_v10 = vadd.f32 %v1981_v61, %v172_v1  ;;  %v136_v12 = vmul.f32 %v1958_v47, %v80_v37 }
  0x88   :  { %v173_v4 = vadd.f32 %v158_v58, %v134_v0  ;;  %v174_v13 = vadd.f32 %v159_v2, %v135_v3 }
  0x89   :  { %v1942_v40 = vpop.permute.xlu1 %211  ;;  %v1944_v41 = vpop.permute.xlu0 %206 }
  0x8a   :  { %v280_v14 = vmul.f32 %v1942_v40, %v1992_v8  ;;  %v279_v15 = vmul.f32 %v1944_v41, %v1989_v7  ;;  %v2005_v16 = vadd.f32 %v1981_v61, %v173_v4  ;;  %v2017_v26 = vadd.f32 %v1981_v61, %v174_v13 }
  0x8c   :  { %v296_v27 = vsel %vm294_vm0, %v280_v14, 0.0  ;;  %v295_v28 = vsel %vm294_vm0, %v279_v15, 0.0 }
  0x8d   :  { %v1955_v45 = vpop.permute.xlu1 %216  ;;  %v85_v46 = vpop.permute.xlu0 %84  ;;  %v297_v38 = vadd.f32 %v296_v27, %v295_v28 }
  0x8e   :  { %v160_v9 = vmul.f32 %v1961_v48, %v85_v46  ;;  %v281_v17 = vmul.f32 %v1955_v45, %v1996_v10  ;;  %v137_v18 = vmul.f32 %v1958_v47, %v85_v46 }
  0x90   :  { %v175_v22 = vadd.f32 %v160_v9, %v136_v12  ;;  %v298_v30 = vsel %vm294_vm0, %v281_v17, 0.0 }
  0x91   :  { %v1963_v49 = vpop.permute.xlu1 %221  ;;  %v90_v50 = vpop.permute.xlu0 %89  ;;  %v299_v55 = vadd.f32 %v298_v30, %v297_v38 }
  0x92   :  { %v161_v11 = vmul.f32 %v1961_v48, %v90_v50  ;;  %v282_v23 = vmul.f32 %v1963_v49, %v2005_v16  ;;  %v138_v24 = vmul.f32 %v1958_v47, %v90_v50  ;;  %v2026_v34 = vadd.f32 %v1981_v61, %v175_v22 }
  0x94   :  { %v176_v25 = vadd.f32 %v161_v11, %v137_v18  ;;  %v300_v44 = vsel %vm294_vm0, %v282_v23, 0.0 }
  0x95   :  { %v1977_v59 = vpop.permute.xlu1 %226  ;;  %v95_v60 = vpop.permute.xlu0 %94  ;;  %v301_v1 = vadd.f32 %v300_v44, %v299_v55 }
  0x96   :  { %v162_v19 = vmul.f32 %v1961_v48, %v95_v60  ;;  %v283_v35 = vmul.f32 %v1977_v59, %v2017_v26  ;;  %v139_v36 = vmul.f32 %v1958_v47, %v95_v60  ;;  %v2034_v46 = vadd.f32 %v1981_v61, %v176_v25 }
  0x98   :  { %v177_v31 = vadd.f32 %v162_v19, %v138_v24  ;;  %v302_v60 = vsel %vm294_vm0, %v283_v35, 0.0 }
  0x99   :  { %v1986_v5 = vpop.permute.xlu1 %231  ;;  %v100_v6 = vpop.permute.xlu0 %99  ;;  %v303_v11 = vadd.f32 %v302_v60, %v301_v1 }
  0x9a   :  { %v163_v29 = vmul.f32 %v1961_v48, %v100_v6  ;;  %v284_v50 = vmul.f32 %v1986_v5, %v2026_v34  ;;  %v140_v51 = vmul.f32 %v1958_v47, %v100_v6  ;;  %v2041_v56 = vadd.f32 %v1981_v61, %v177_v31 }
  0x9c   :  { %v178_v52 = vadd.f32 %v163_v29, %v139_v36  ;;  %v304_v3 = vsel %vm294_vm0, %v284_v50, 0.0 }
  0x9d   :  { %v2011_v20 = vpop.permute.xlu1 %236  ;;  %v105_v21 = vpop.permute.xlu0 %104  ;;  %v305_v19 = vadd.f32 %v304_v3, %v303_v11 }
  0x9e   :  { %v164_v37 = vmul.f32 %v1961_v48, %v105_v21  ;;  %v285_v62 = vmul.f32 %v2011_v20, %v2034_v46  ;;  %v141_v63 = vmul.f32 %v1958_v47, %v105_v21  ;;  %v2053_v4 = vadd.f32 %v1981_v61, %v178_v52 }
  0xa0   :  { %v179_v0 = vadd.f32 %v164_v37, %v140_v51  ;;  %v306_v14 = vsel %vm294_vm0, %v285_v62, 0.0 }
  0xa1   :  { %v2023_v32 = vpop.permute.xlu1 %241  ;;  %v110_v33 = vpop.permute.xlu0 %109  ;;  %v307_v27 = vadd.f32 %v306_v14, %v305_v19  ;;  %v539_v19 = vld [vmem:[%s3007_s3 + $0x10] sm:$0xff] }
  0xa2   :  { %v165_v54 = vmul.f32 %v1961_v48, %v110_v33  ;;  %v286_v2 = vmul.f32 %v2023_v32, %v2041_v56  ;;  %v2060_v15 = vadd.f32 %v1981_v61, %v179_v0  ;;  %v142_v17 = vmul.f32 %v1958_v47, %v110_v33 }
  0xa4   :  { %v180_v6 = vadd.f32 %v165_v54, %v141_v63  ;;  %v308_v21 = vsel %vm294_vm0, %v286_v2, 0.0 }
  0xa5   :  { %v2043_v57 = vpop.permute.xlu1 %246  ;;  %v115_v58 = vpop.permute.xlu0 %114  ;;  %v309_v37 = vadd.f32 %v308_v21, %v307_v27 }
  0xa6   :  { %v166_v9 = vmul.f32 %v1961_v48, %v115_v58  ;;  %v287_v18 = vmul.f32 %v2043_v57, %v2053_v4  ;;  %v2067_v22 = vadd.f32 %v1981_v61, %v180_v6  ;;  %v143_v28 = vmul.f32 %v1958_v47, %v115_v58 }
  0xa8   :  { %v181_v23 = vadd.f32 %v166_v9, %v142_v17  ;;  %v310_v31 = vsel %vm294_vm0, %v287_v18, 0.0 }
  0xa9   :  { %v2056_v12 = vpop.permute.xlu1 %251  ;;  %v120_v13 = vpop.permute.xlu0 %119  ;;  %v311_v52 = vadd.f32 %v310_v31, %v309_v37 }
  0xaa   :  { %v288_v24 = vmul.f32 %v2056_v12, %v2060_v15  ;;  %v167_v25 = vmul.f32 %v1961_v48, %v120_v13  ;;  %v144_v33 = vmul.f32 %v1958_v47, %v120_v13  ;;  %v2081_v38 = vadd.f32 %v1981_v61, %v181_v23  ;;  %v540_v13 = vld [vmem:[%s3007_s3 + $0x18] sm:$0xff] }
  0xac   :  { %v312_v44 = vsel %vm294_vm0, %v288_v24, 0.0  ;;  %v182_v50 = vadd.f32 %v167_v25, %v143_v28 }
  0xad   :  { %v2073_v29 = vpop.permute.xlu1 %256  ;;  %v125_v30 = vpop.permute.xlu0 %124  ;;  %v313_v0 = vadd.f32 %v312_v44, %v311_v52 }
  0xae   :  { %v289_v35 = vmul.f32 %v2073_v29, %v2067_v22  ;;  %v168_v36 = vmul.f32 %v1961_v48, %v125_v30  ;;  %v145_v58 = vmul.f32 %v1958_v47, %v125_v30  ;;  %v2092_v1 = vadd.f32 %v1981_v61, %v182_v50 }
  0xb0   :  { %v183_v51 = vadd.f32 %v168_v36, %v144_v33  ;;  %v314_v63 = vsel %vm294_vm0, %v289_v35, 0.0 }
  0xb1   :  { %v2084_v54 = vpop.permute.xlu1 %261  ;;  %v149_v55 = vpop.permute.xlu0 %148  ;;  %v315_v11 = vadd.f32 %v314_v63, %v313_v0 }
  0xb2   :  { %v290_v60 = vmul.f32 %v2084_v54, %v2081_v38  ;;  %v169_v62 = vmul.f32 %v1961_v48, %v149_v55  ;;  %v2095_v2 = vadd.f32 %v1981_v61, %v183_v51  ;;  %v541_v48 = vld [vmem:[%s3007_s3 + $0x20] sm:$0xff] }
  0xb3   :  { %1676 = vmatprep.subr.mxu0 %v541_v48 }
  0xb4   :  { %v184_v3 = vadd.f32 %v169_v62, %v145_v58  ;;  %v316_v6 = vsel %vm294_vm0, %v290_v60, 0.0  ;;  %1677 = vmatpush3.msra.mxu0 %v541_v48 }
  0xb5   :  { %v2098_v9 = vpop.permute.xlu1 %271  ;;  %v2100_v47 = vpop.permute.xlu0 %266  ;;  %v317_v18 = vadd.f32 %v316_v6, %v315_v11  ;;  %1678 = vmatprep.subr.mxu0 %v540_v13 }
  0xb6   :  { %v292_v14 = vmul.f32 %v2098_v9, %v2095_v2  ;;  %v291_v17 = vmul.f32 %v2100_v47, %v2092_v1  ;;  %v2116_v21 = vadd.f32 %v1981_v61, %v184_v3  ;;  %1679 = vmatpush3.msra.mxu0 %v540_v13 }
  0xb7   :  { %1680 = vmatprep.subr.mxu0 %v539_v19 }
  0xb8   :  { %v318_v23 = vsel %vm294_vm0, %v291_v17, 0.0  ;;  %v320_v28 = vsel %vm294_vm0, %v292_v14, 0.0  ;;  %1681 = vmatpush3.msra.mxu0 %v539_v19 }
  0xb9   :  { %v2119_v24 = vpop.permute.xlu0 %276  ;;  %v319_v25 = vadd.f32 %v318_v23, %v317_v18 }
  0xba   :  { %v293_v27 = vmul.f32 %v2119_v24, %v2116_v21 }
  0xbb   :  { %v321_v30 = vadd.f32 %v320_v28, %v319_v25 }
  0xbc   :  { %v322_v31 = vsel %vm294_vm0, %v293_v27, 0.0 }
  0xbd   :  { %v323_v33 = vadd.f32 %v322_v31, %v321_v30 }
  0xbf   :  { %v324_v61 = vrot.slane %v323_v33, 4 }
  0xc1   :  { %v325_v35 = vadd.f32 %v324_v61, %v323_v33 }
  0xc3   :  { %v326_v36 = vrot.slane %v325_v35, 2 }
  0xc5   :  { %v327_v37 = vadd.f32 %v326_v36, %v325_v35 }
  0xc7   :  { %v328_v44 = vrot.slane %v327_v37, 1 }
  0xc9   :  { %v329_v50 = vadd.f32 %v328_v44, %v327_v37 }
  0xcb   :  { %v330_v51 = vmul.f32 0.033333335, %v329_v50 }
  0xcd   :  { %v2126_v52 = vsub.f32 %v1989_v7, %v330_v51  ;;  %v2129_v55 = vsub.f32 %v1992_v8, %v330_v51  ;;  %v2132_v58 = vsub.f32 %v1996_v10, %v330_v51  ;;  %v2135_v60 = vsub.f32 %v2005_v16, %v330_v51 }
  0xce   :  { %v2142_v0 = vsub.f32 %v2017_v26, %v330_v51  ;;  %v2147_v8 = vsub.f32 %v2026_v34, %v330_v51  ;;  %v2152_v6 = vsub.f32 %v2034_v46, %v330_v51  ;;  %v2157_v26 = vsub.f32 %v2041_v56, %v330_v51 }
  0xcf   :  { %v346_v62 = vmul.f32 %v2126_v52, %v1944_v41  ;;  %v347_v63 = vmul.f32 %v2129_v55, %v1942_v40  ;;  %v348_v7 = vmul.f32 %v2132_v58, %v1955_v45  ;;  %v349_v10 = vmul.f32 %v2135_v60, %v1963_v49 }
  0xd0   :  { %v350_v11 = vmul.f32 %v2142_v0, %v1977_v59  ;;  %v351_v13 = vmul.f32 %v2147_v8, %v1986_v5  ;;  %v2164_v19 = vsub.f32 %v2053_v4, %v330_v51  ;;  %v352_v46 = vmul.f32 %v2152_v6, %v2011_v20 }
  0xd1   :  { %v361_v16 = vmul.f32 %v346_v62, %v346_v62  ;;  %v362_v3 = vmul.f32 %v347_v63, %v347_v63  ;;  %v363_v48 = vmul.f32 %v348_v7, %v348_v7  ;;  %v364_v34 = vmul.f32 %v349_v10, %v349_v10 }
  0xd2   :  { %v365_v23 = vmul.f32 %v350_v11, %v350_v11  ;;  %v2170_v27 = vsub.f32 %v2060_v15, %v330_v51  ;;  %v353_v28 = vmul.f32 %v2157_v26, %v2023_v32  ;;  %v366_v30 = vmul.f32 %v351_v13, %v351_v13 }
  0xd3   :  { %v376_v14 = vsel %vm294_vm0, %v361_v16, 0.0  ;;  %v377_v17 = vsel %vm294_vm0, %v362_v3, 0.0  ;;  %v379_v25 = vsel %vm294_vm0, %v363_v48, 0.0  ;;  %v381_v31 = vsel %vm294_vm0, %v364_v34, 0.0 }
  0xd4   :  { %v378_v18 = vadd.f32 %v377_v17, %v376_v14  ;;  %v2176_v4 = vsub.f32 %v2067_v22, %v330_v51  ;;  %v354_v61 = vmul.f32 %v2164_v19, %v2043_v57  ;;  %v367_v35 = vmul.f32 %v352_v46, %v352_v46 }
  0xd5   :  { %v383_v36 = vsel %vm294_vm0, %v365_v23, 0.0  ;;  %v2182_v15 = vsub.f32 %v2081_v38, %v330_v51  ;;  %v355_v44 = vmul.f32 %v2170_v27, %v2056_v12  ;;  %v368_v50 = vmul.f32 %v353_v28, %v353_v28 }
  0xd6   :  { %v380_v56 = vadd.f32 %v379_v25, %v378_v18  ;;  %v385_v62 = vsel %vm294_vm0, %v366_v30, 0.0  ;;  %v2188_v22 = vsub.f32 %v2092_v1, %v330_v51  ;;  %v356_v7 = vmul.f32 %v2176_v4, %v2073_v29 }
  0xd7   :  { %v369_v10 = vmul.f32 %v354_v61, %v354_v61  ;;  %v387_v16 = vsel %vm294_vm0, %v367_v35, 0.0  ;;  %v2194_v38 = vsub.f32 %v2095_v2, %v330_v51  ;;  %v357_v11 = vmul.f32 %v2182_v15, %v2084_v54 }
  0xd8   :  { %v382_v33 = vadd.f32 %v381_v31, %v380_v56  ;;  %v370_v48 = vmul.f32 %v355_v44, %v355_v44  ;;  %v389_v13 = vsel %vm294_vm0, %v368_v50, 0.0  ;;  %v2200_v1 = vsub.f32 %v2116_v21, %v330_v51 }
  0xd9   :  { %v358_v14 = vmul.f32 %v2188_v22, %v2100_v47  ;;  %v371_v17 = vmul.f32 %v356_v7, %v356_v7  ;;  %v391_v18 = vsel %vm294_vm0, %v369_v10, 0.0  ;;  %v359_v2 = vmul.f32 %v2194_v38, %v2098_v9 }
  0xda   :  { %v384_v37 = vadd.f32 %v383_v36, %v382_v33  ;;  %v372_v23 = vmul.f32 %v357_v11, %v357_v11  ;;  %v393_v25 = vsel %vm294_vm0, %v370_v48, 0.0  ;;  %v360_v28 = vmul.f32 %v2200_v1, %v2119_v24 }
  0xdb   :  { %v373_v30 = vmul.f32 %v358_v14, %v358_v14  ;;  %v395_v21 = vsel %vm294_vm0, %v371_v17, 0.0  ;;  %v374_v31 = vmul.f32 %v359_v2, %v359_v2  ;;  %v436_v14 = vsub.s32 2, %v1940_v39 }
  0xdc   :  { %v386_v63 = vadd.f32 %v385_v62, %v384_v37  ;;  %v397_v33 = vsel %vm294_vm0, %v372_v23, 0.0  ;;  %v375_v35 = vmul.f32 %v360_v28, %v360_v28 }
  0xdd   :  { %v399_v36 = vsel %vm294_vm0, %v373_v30, 0.0  ;;  %v401_v44 = vsel %vm294_vm0, %v374_v31, 0.0  ;;  %v437_v2 = vrot.slane %v1970_v53, %v436_v14 }
  0xde   :  { %v388_v3 = vadd.f32 %v387_v16, %v386_v63  ;;  %v403_v62 = vsel %vm294_vm0, %v375_v35, 0.0 }
  0xe0   :  { %v390_v34 = vadd.f32 %v389_v13, %v388_v3 }
  0xe2   :  { %v392_v46 = vadd.f32 %v391_v18, %v390_v34  ;;  %v538_v34 = vld [vmem:[%s3007_s3 + $0x8] sm:$0xff] }
  0xe3   :  { %1682 = vmatprep.subr.mxu0 %v538_v34 }
  0xe4   :  { %v394_v56 = vadd.f32 %v393_v25, %v392_v46  ;;  %1683 = vmatpush3.msra.mxu0 %v538_v34 }
  0xe6   :  { %v396_v51 = vadd.f32 %v395_v21, %v394_v56 }
  0xe8   :  { %v398_v61 = vadd.f32 %v397_v33, %v396_v51 }
  0xea   :  { %v400_v37 = vadd.f32 %v399_v36, %v398_v61 }
  0xec   :  { %v402_v50 = vadd.f32 %v401_v44, %v400_v37 }
  0xee   :  { %v404_v63 = vadd.f32 %v403_v62, %v402_v50 }
  0xf0   :  { %v405_v7 = vrot.slane %v404_v63, 4 }
  0xf2   :  { %v406_v24 = vadd.f32 %v405_v7, %v404_v63 }
  0xf4   :  { %v407_v10 = vrot.slane %v406_v24, 2 }
  0xf6   :  { %v408_v16 = vadd.f32 %v407_v10, %v406_v24 }
  0xf8   :  { %v409_v3 = vrot.slane %v408_v16, 1 }
  0xfa   :  { %v410_v11 = vadd.f32 %v409_v3, %v408_v16 }
  0xfc   :  { %v411_v48 = vmul.f32 0.033333335, %v410_v11 }
  0xfe   :  { %v412_v13 = vadd.f32 1e-05, %v411_v48 }
 0x100   :  { %1785 = vrsqrt.f32 %v412_v13 }
 0x10d   :  { %v1786_v17 = vpop.eup %1785 }
 0x10e   :  { %v414_v18 = vmul.f32 %v1786_v17, %v1970_v53 }
 0x110   :  { %v418_v46 = vrot.slane %v414_v18, %v1950_v43 }
 0x112   :  { %v421_v23 = vmul.f32 %v418_v46, %v2132_v58  ;;  %v420_v25 = vmul.f32 %v418_v46, %v2129_v55  ;;  %v423_v56 = vmul.f32 %v418_v46, %v2142_v0  ;;  %v422_v28 = vmul.f32 %v418_v46, %v2135_v60 }
 0x113   :  { %v425_v51 = vmul.f32 %v418_v46, %v2152_v6  ;;  %v424_v31 = vmul.f32 %v418_v46, %v2147_v8  ;;  %v427_v55 = vmul.f32 %v418_v46, %v2164_v19  ;;  %v426_v58 = vmul.f32 %v418_v46, %v2157_v26 }
 0x114   :  { %v2226_v30 = vadd.f32 %v437_v2, %v421_v23  ;;  %v439_v21 = vadd.f32 %v437_v2, %v420_v25  ;;  %v2231_v35 = vadd.f32 %v437_v2, %v423_v56  ;;  %v441_v36 = vadd.f32 %v437_v2, %v422_v28 }
 0x115   :  { %v419_v60 = vmul.f32 %v418_v46, %v2126_v52  ;;  %v2241_v6 = vadd.f32 %v437_v2, %v425_v51  ;;  %v443_v37 = vadd.f32 %v437_v2, %v424_v31  ;;  %v2245_v50 = vadd.f32 %v437_v2, %v427_v55 }
 0x116   :  { %v455_v33 = vmax.f32 %v2226_v30, 0.0  ;;  %v454_v61 = vmax.f32 %v439_v21, 0.0  ;;  %v457_v0 = vmax.f32 %v2231_v35, 0.0  ;;  %v456_v8 = vmax.f32 %v441_v36, 0.0 }
 0x117   :  { %v438_v44 = vadd.f32 %v437_v2, %v419_v60  ;;  %v445_v62 = vadd.f32 %v437_v2, %v426_v58  ;;  %v459_v19 = vmax.f32 %v2241_v6, 0.0  ;;  %v458_v63 = vmax.f32 %v443_v37, 0.0 }
 0x118   :  { %484 = vrot.lane.b32.xlu0 %v455_v33, %s1815_s9  ;;  %482 = vrot.lane.b32.xlu1 %v454_v61, %s1815_s9  ;;  %v429_v26 = vmul.f32 %v418_v46, %v2176_v4  ;;  %v428_v52 = vmul.f32 %v418_v46, %v2170_v27  ;;  %v461_v7 = vmax.f32 %v2245_v50, 0.0  ;;  %v431_v3 = vmul.f32 %v418_v46, %v2188_v22 }
 0x119   :  { %v460_v24 = vmax.f32 %v445_v62, 0.0  ;;  %v430_v11 = vmul.f32 %v418_v46, %v2182_v15  ;;  %v433_v4 = vmul.f32 %v418_v46, %v2200_v1  ;;  %v432_v27 = vmul.f32 %v418_v46, %v2194_v38 }
 0x11a   :  { %v448_v10 = vadd.f32 %v437_v2, %v429_v26  ;;  %v447_v16 = vadd.f32 %v437_v2, %v428_v52  ;;  %v450_v34 = vadd.f32 %v437_v2, %v431_v3  ;;  %v453_v38 = vmax.f32 %v438_v44, 0.0 }
 0x11b   :  { %v449_v14 = vadd.f32 %v437_v2, %v430_v11  ;;  %v452_v18 = vadd.f32 %v437_v2, %v433_v4  ;;  %v451_v15 = vadd.f32 %v437_v2, %v432_v27 }
 0x11c   :  { %488 = vrot.lane.b32.xlu0 %v457_v0, %s1815_s9  ;;  %486 = vrot.lane.b32.xlu1 %v456_v8, %s1815_s9  ;;  %v463_v48 = vmax.f32 %v448_v10, 0.0  ;;  %v462_v13 = vmax.f32 %v447_v16, 0.0  ;;  %v465_v17 = vmax.f32 %v450_v34, 0.0 }
 0x11d   :  { %v464_v22 = vmax.f32 %v449_v14, 0.0  ;;  %v467_v23 = vmax.f32 %v452_v18, 0.0  ;;  %v466_v1 = vmax.f32 %v451_v15, 0.0 }
 0x120   :  { %492 = vrot.lane.b32.xlu0 %v459_v19, %s1815_s9  ;;  %490 = vrot.lane.b32.xlu1 %v458_v63, %s1815_s9 }
 0x124   :  { %496 = vrot.lane.b32.xlu0 %v461_v7, %s1815_s9  ;;  %494 = vrot.lane.b32.xlu1 %v460_v24, %s1815_s9 }
 0x128   :  { %500 = vrot.lane.b32.xlu0 %v463_v48, %s1815_s9  ;;  %498 = vrot.lane.b32.xlu1 %v462_v13, %s1815_s9 }
 0x12c   :  { %504 = vrot.lane.b32.xlu0 %v465_v17, %s1815_s9  ;;  %502 = vrot.lane.b32.xlu1 %v464_v22, %s1815_s9 }
 0x130   :  { %508 = vrot.lane.b32.xlu0 %v467_v23, %s1815_s9  ;;  %506 = vrot.lane.b32.xlu1 %v466_v1, %s1815_s9 }
 0x18a   :  { %v485_v46 = vpop.permute.xlu0 %484  ;;  %v483_v25 = vpop.permute.xlu1 %482 }
 0x18b   :  { %v525_v56 = vsel %vm294_vm0, %v454_v61, %v485_v46  ;;  %v524_v28 = vsel %vm294_vm0, %v453_v38, %v483_v25 }
 0x18c   :  { %1684 = vmatprep.mubr.msk.f32.mxu0 %vm546_vm1, %v524_v28 }
 0x18d   :  { %1685 = vmatmul.mubr.msk.f32.vlgmr.msra.gmra.mxu0 %vm546_vm1, %v525_v56 }
 0x18e   :  { %v489_v2 = vpop.permute.xlu0 %488  ;;  %v487_v21 = vpop.permute.xlu1 %486 }
 0x18f   :  { %v527_v51 = vsel %vm294_vm0, %v456_v8, %v489_v2  ;;  %v526_v31 = vsel %vm294_vm0, %v455_v33, %v487_v21 }
 0x190   :  { %1687 = vmatprep.mubr.msk.f32.mxu0 %vm546_vm1, %v526_v31 }
 0x191   :  { %1688 = vmatmul.mubr.msk.f32.gmra.mxu0 %vm546_vm1, %v527_v51 }
 0x192   :  { %v493_v35 = vpop.permute.xlu0 %492  ;;  %v491_v61 = vpop.permute.xlu1 %490 }
 0x193   :  { %v529_v36 = vsel %vm294_vm0, %v458_v63, %v493_v35  ;;  %v528_v55 = vsel %vm294_vm0, %v457_v0, %v491_v61 }
 0x194   :  { %1690 = vmatprep.mubr.msk.f32.mxu0 %vm546_vm1, %v528_v55 }
 0x195   :  { %1691 = vmatmul.mubr.msk.f32.gmra.mxu0 %vm546_vm1, %v529_v36 }
 0x196   :  { %v497_v58 = vpop.permute.xlu0 %496  ;;  %v495_v60 = vpop.permute.xlu1 %494 }
 0x197   :  { %v531_v30 = vsel %vm294_vm0, %v460_v24, %v497_v58  ;;  %v530_v33 = vsel %vm294_vm0, %v459_v19, %v495_v60  ;;  %v544_v24 = vsub.s32 3, %v1940_v39 }
 0x198   :  { %1693 = vmatprep.mubr.msk.f32.mxu0 %vm546_vm1, %v530_v33 }
 0x199   :  { %1694 = vmatmul.mubr.msk.f32.gmra.mxu0 %vm546_vm1, %v531_v30  ;;  %v2297_v10 = vrot.slane %v1970_v53, %v544_v24 }
 0x19a   :  { %v501_v8 = vpop.permute.xlu0 %500  ;;  %v499_v6 = vpop.permute.xlu1 %498 }
 0x19b   :  { %v533_v37 = vsel %vm294_vm0, %v462_v13, %v501_v8  ;;  %v532_v0 = vsel %vm294_vm0, %v461_v7, %v499_v6 }
 0x19c   :  { %1696 = vmatprep.mubr.msk.f32.mxu0 %vm546_vm1, %v532_v0 }
 0x19d   :  { %1697 = vmatmul.mubr.msk.f32.gmra.mxu0 %vm546_vm1, %v533_v37 }
 0x19e   :  { %v505_v44 = vpop.permute.xlu0 %504  ;;  %v503_v50 = vpop.permute.xlu1 %502 }
 0x19f   :  { %v535_v62 = vsel %vm294_vm0, %v464_v22, %v505_v44  ;;  %v534_v19 = vsel %vm294_vm0, %v463_v48, %v503_v50 }
 0x1a0   :  { %1699 = vmatprep.mubr.msk.f32.mxu0 %vm546_vm1, %v534_v19 }
 0x1a1   :  { %1700 = vmatmul.mubr.msk.f32.gmra.mxu0 %vm546_vm1, %v535_v62 }
 0x1a2   :  { %v509_v63 = vpop.permute.xlu0 %508  ;;  %v507_v26 = vpop.permute.xlu1 %506 }
 0x1a3   :  { %v537_v52 = vsel %vm294_vm0, %v466_v1, %v509_v63  ;;  %v536_v7 = vsel %vm294_vm0, %v465_v17, %v507_v26 }
 0x1a4   :  { %1702 = vmatprep.mubr.msk.f32.mxu0 %vm546_vm1, %v536_v7 }
 0x1a5   :  { %1703 = vmatmul.mubr.msk.f32.gmra.mxu0 %vm546_vm1, %v537_v52 }
 0x24d   :  { %v1686_v16 = vpop.f32.mrf.mxu0 }
 0x24e   :  { %v2300_v3 = vadd.f32 %v1686_v16, %v2297_v10 }
 0x24f   :  { %v655_v11 = vpop.f32.mrf.mxu0 }
 0x250   :  { %v2303_v4 = vadd.f32 %v655_v11, %v2297_v10  ;;  %v725_v48 = vmul.f32 %v2300_v3, %v1942_v40 }
 0x251   :  { %v1689_v27 = vpop.f32.mrf.mxu0 }
 0x252   :  { %v724_v13 = vmul.f32 %v2303_v4, %v1944_v41  ;;  %v2310_v34 = vadd.f32 %v1689_v27, %v2297_v10  ;;  %v739_v18 = vsel %vm546_vm1, %v725_v48, 0.0 }
 0x253   :  { %v665_v53 = vpop.f32.mrf.mxu0 }
 0x254   :  { %v738_v14 = vsel %vm546_vm1, %v724_v13, 0.0  ;;  %v2314_v17 = vadd.f32 %v665_v53, %v2297_v10  ;;  %v727_v15 = vmul.f32 %v2310_v34, %v1963_v49  ;;  %v973_v13 = vld [vmem:[%s3007_s3 + $0x60] sm:$0xff] }
 0x255   :  { %v1692_v22 = vpop.f32.mrf.mxu0  ;;  %v740_v38 = vadd.f32 %v739_v18, %v738_v14  ;;  %v972_v18 = vld [vmem:[%s3007_s3 + $0x58] sm:$0xff] }
 0x256   :  { %v726_v23 = vmul.f32 %v2314_v17, %v1955_v45  ;;  %v2322_v1 = vadd.f32 %v1692_v22, %v2297_v10  ;;  %v743_v21 = vsel %vm546_vm1, %v727_v15, 0.0  ;;  %v1816_v22 = vmov 0.0  }
 0x257   :  { %v675_v46 = vpop.f32.mrf.mxu0  ;;  %1705 = vmatprep.subr.mxu1 %v1816_v22  ;;  %1721 = vmatprep.mubr.msk.f32.mxu1 %vm1817_vm2, %v1816_v22 }
 0x258   :  { %v741_v25 = vsel %vm546_vm1, %v726_v23, 0.0  ;;  %v2326_v56 = vadd.f32 %v675_v46, %v2297_v10  ;;  %v729_v51 = vmul.f32 %v2322_v1, %v1986_v5  ;;  %1706 = vmatpush3.msra.mxu1 %v973_v13 }
 0x259   :  { %v742_v28 = vadd.f32 %v741_v25, %v740_v38  ;;  %v1695_v2 = vpop.f32.mrf.mxu0  ;;  %1707 = vmatprep.subr.mxu1 %v1816_v22 }
 0x25a   :  { %v728_v31 = vmul.f32 %v2326_v56, %v1977_v59  ;;  %v2334_v35 = vadd.f32 %v1695_v2, %v2297_v10  ;;  %v747_v33 = vsel %vm546_vm1, %v729_v51, 0.0  ;;  %v971_v2 = vld [vmem:[%s3007_s3 + $0x50] sm:$0xff]  ;;  %1708 = vmatpush3.msra.mxu1 %v972_v18 }
 0x25b   :  { %v744_v61 = vadd.f32 %v743_v21, %v742_v28  ;;  %v685_v36 = vpop.f32.mrf.mxu0  ;;  %1709 = vmatprep.subr.mxu1 %v1816_v22 }
 0x25c   :  { %v745_v55 = vsel %vm546_vm1, %v728_v31, 0.0  ;;  %v2338_v58 = vadd.f32 %v685_v36, %v2297_v10  ;;  %v731_v8 = vmul.f32 %v2334_v35, %v2023_v32  ;;  %1710 = vmatpush3.msra.mxu1 %v971_v2 }
 0x25d   :  { %v746_v60 = vadd.f32 %v745_v55, %v744_v61  ;;  %v1698_v30 = vpop.f32.mrf.mxu0  ;;  %v970_v61 = vld [vmem:[%s3007_s3 + $0x48] sm:$0xff]  ;;  %1711 = vmatprep.subr.mxu1 %v1816_v22 }
 0x25e   :  { %v730_v6 = vmul.f32 %v2338_v58, %v2011_v20  ;;  %v2346_v37 = vadd.f32 %v1698_v30, %v2297_v10  ;;  %v751_v26 = vsel %vm546_vm1, %v731_v8, 0.0  ;;  %1712 = vmatpush3.msra.mxu1 %v970_v61 }
 0x25f   :  { %v748_v0 = vadd.f32 %v747_v33, %v746_v60  ;;  %v695_v44 = vpop.f32.mrf.mxu0  ;;  %1713 = vmatprep.subr.mxu1 %v1816_v22 }
 0x260   :  { %v749_v50 = vsel %vm546_vm1, %v730_v6, 0.0  ;;  %v2350_v62 = vadd.f32 %v695_v44, %v2297_v10  ;;  %v733_v52 = vmul.f32 %v2346_v37, %v2056_v12  ;;  %v968_v6 = vld [vmem:[%s3007_s3 + $0x38] sm:$0xff] }
 0x261   :  { %v750_v19 = vadd.f32 %v749_v50, %v748_v0  ;;  %v1701_v63 = vpop.f32.mrf.mxu0  ;;  %v967_v50 = vld [vmem:[%s3007_s3 + $0x30] sm:$0xff] }
 0x262   :  { %v732_v7 = vmul.f32 %v2350_v62, %v2043_v57  ;;  %v2358_v24 = vadd.f32 %v1701_v63, %v2297_v10  ;;  %v755_v15 = vsel %vm546_vm1, %v733_v52, 0.0 }
 0x263   :  { %v752_v16 = vadd.f32 %v751_v26, %v750_v19  ;;  %v705_v11 = vpop.f32.mrf.mxu0 }
 0x264   :  { %v753_v27 = vsel %vm546_vm1, %v732_v7, 0.0  ;;  %v2362_v48 = vadd.f32 %v705_v11, %v2297_v10  ;;  %v735_v23 = vmul.f32 %v2358_v24, %v2084_v54 }
 0x265   :  { %v754_v53 = vadd.f32 %v753_v27, %v752_v16  ;;  %v1704_v14 = vpop.f32.mrf.mxu0 }
 0x266   :  { %v734_v38 = vmul.f32 %v2362_v48, %v2073_v29  ;;  %v2377_v46 = vadd.f32 %v1704_v14, %v2297_v10  ;;  %v759_v36 = vsel %vm546_vm1, %v735_v23, 0.0 }
 0x267   :  { %v756_v25 = vadd.f32 %v755_v15, %v754_v53  ;;  %v715_v28 = vpop.f32.mrf.mxu0 }
 0x268   :  { %v757_v21 = vsel %vm546_vm1, %v734_v38, 0.0  ;;  %v2385_v51 = vadd.f32 %v715_v28, %v2297_v10  ;;  %v737_v55 = vmul.f32 %v2377_v46, %v2098_v9  ;;  %v969_v10 = vld [vmem:[%s3007_s3 + $0x40] sm:$0xff] }
 0x269   :  { %v758_v31 = vadd.f32 %v757_v21, %v756_v25  ;;  %1714 = vmatpush3.msra.mxu1 %v969_v10 }
 0x26a   :  { %v736_v60 = vmul.f32 %v2385_v51, %v2100_v47  ;;  %v763_v0 = vsel %vm546_vm1, %v737_v55, 0.0  ;;  %1715 = vmatprep.subr.mxu1 %v1816_v22 }
 0x26b   :  { %v760_v30 = vadd.f32 %v759_v36, %v758_v31  ;;  %1716 = vmatpush3.msra.mxu1 %v968_v6 }
 0x26c   :  { %v761_v33 = vsel %vm546_vm1, %v736_v60, 0.0  ;;  %1717 = vmatprep.subr.mxu1 %v1816_v22 }
 0x26d   :  { %v762_v8 = vadd.f32 %v761_v33, %v760_v30  ;;  %1718 = vmatpush3.msra.mxu1 %v967_v50 }
 0x26e   :  { %1719 = vmatprep.subr.mxu1 %v1816_v22 }
 0x26f   :  { %v764_v44 = vadd.f32 %v763_v0, %v762_v8 }
 0x271   :  { %v765_v19 = vrot.slane %v764_v44, 4 }
 0x273   :  { %v766_v63 = vadd.f32 %v765_v19, %v764_v44 }
 0x275   :  { %v767_v26 = vrot.slane %v766_v63, 2 }
 0x277   :  { %v768_v52 = vadd.f32 %v767_v26, %v766_v63 }
 0x279   :  { %v769_v7 = vrot.slane %v768_v52, 1 }
 0x27b   :  { %v770_v16 = vadd.f32 %v769_v7, %v768_v52 }
 0x27d   :  { %v771_v11 = vmul.f32 0.035714287, %v770_v16 }
 0x27f   :  { %v2413_v27 = vsub.f32 %v2303_v4, %v771_v11  ;;  %v2416_v13 = vsub.f32 %v2300_v3, %v771_v11  ;;  %v2419_v53 = vsub.f32 %v2314_v17, %v771_v11  ;;  %v2422_v14 = vsub.f32 %v2310_v34, %v771_v11 }
 0x280   :  { %v2429_v23 = vsub.f32 %v2326_v56, %v771_v11  ;;  %v2434_v3 = vsub.f32 %v2322_v1, %v771_v11  ;;  %v2439_v25 = vsub.f32 %v2338_v58, %v771_v11  ;;  %v2444_v56 = vsub.f32 %v2334_v35, %v771_v11 }
 0x281   :  { %v786_v18 = vmul.f32 %v2413_v27, %v1944_v41  ;;  %v787_v15 = vmul.f32 %v2416_v13, %v1942_v40  ;;  %v788_v4 = vmul.f32 %v2419_v53, %v1955_v45  ;;  %v789_v17 = vmul.f32 %v2422_v14, %v1963_v49 }
 0x282   :  { %v790_v28 = vmul.f32 %v2429_v23, %v1977_v59  ;;  %v791_v21 = vmul.f32 %v2434_v3, %v1986_v5  ;;  %v2451_v55 = vsub.f32 %v2350_v62, %v771_v11  ;;  %v792_v58 = vmul.f32 %v2439_v25, %v2011_v20 }
 0x283   :  { %v800_v34 = vmul.f32 %v786_v18, %v786_v18  ;;  %v801_v38 = vmul.f32 %v787_v15, %v787_v15  ;;  %v802_v2 = vmul.f32 %v788_v4, %v788_v4  ;;  %v803_v1 = vmul.f32 %v789_v17, %v789_v17 }
 0x284   :  { %v804_v60 = vmul.f32 %v790_v28, %v790_v28  ;;  %v2457_v10 = vsub.f32 %v2346_v37, %v771_v11  ;;  %v793_v33 = vmul.f32 %v2444_v56, %v2023_v32  ;;  %v805_v8 = vmul.f32 %v791_v21, %v791_v21 }
 0x285   :  { %v814_v31 = vsel %vm546_vm1, %v800_v34, 0.0  ;;  %v815_v61 = vsel %vm546_vm1, %v801_v38, 0.0  ;;  %v817_v30 = vsel %vm546_vm1, %v802_v2, 0.0  ;;  %v819_v6 = vsel %vm546_vm1, %v803_v1, 0.0 }
 0x286   :  { %v816_v36 = vadd.f32 %v815_v61, %v814_v31  ;;  %v2463_v62 = vsub.f32 %v2362_v48, %v771_v11  ;;  %v794_v44 = vmul.f32 %v2451_v55, %v2043_v57  ;;  %v806_v50 = vmul.f32 %v792_v58, %v792_v58 }
 0x287   :  { %v821_v19 = vsel %vm546_vm1, %v804_v60, 0.0  ;;  %v2469_v37 = vsub.f32 %v2358_v24, %v771_v11  ;;  %v795_v26 = vmul.f32 %v2457_v10, %v2056_v12  ;;  %v807_v52 = vmul.f32 %v793_v33, %v793_v33 }
 0x288   :  { %v818_v35 = vadd.f32 %v817_v30, %v816_v36  ;;  %v823_v7 = vsel %vm546_vm1, %v805_v8, 0.0  ;;  %v2475_v48 = vsub.f32 %v2385_v51, %v771_v11  ;;  %v796_v18 = vmul.f32 %v2463_v62, %v2073_v29 }
 0x289   :  { %v808_v15 = vmul.f32 %v794_v44, %v794_v44  ;;  %v825_v4 = vsel %vm546_vm1, %v806_v50, 0.0  ;;  %v2481_v24 = vsub.f32 %v2377_v46, %v771_v11  ;;  %v797_v34 = vmul.f32 %v2469_v37, %v2084_v54 }
 0x28a   :  { %v820_v0 = vadd.f32 %v819_v6, %v818_v35  ;;  %v809_v38 = vmul.f32 %v795_v26, %v795_v26  ;;  %v827_v28 = vsel %vm546_vm1, %v807_v52, 0.0  ;;  %v798_v51 = vmul.f32 %v2475_v48, %v2100_v47 }
 0x28b   :  { %v810_v21 = vmul.f32 %v796_v18, %v796_v18  ;;  %v829_v1 = vsel %vm546_vm1, %v808_v15, 0.0  ;;  %v799_v61 = vmul.f32 %v2481_v24, %v2098_v9  ;;  %v811_v36 = vmul.f32 %v797_v34, %v797_v34  ;;  %v966_v15 = vld [vmem:[%s3007_s3 + $0x28] sm:$0xff] }
 0x28c   :  { %v822_v63 = vadd.f32 %v821_v19, %v820_v0  ;;  %v831_v46 = vsel %vm546_vm1, %v809_v38, 0.0  ;;  %v812_v58 = vmul.f32 %v798_v51, %v798_v51  ;;  %1720 = vmatpush3.msra.mxu1 %v966_v15  ;;  %v2507_v38 = vld [vmem:[%s3006_s2] sm:$0xff] }
 0x28d   :  { %v833_v60 = vsel %vm546_vm1, %v810_v21, 0.0  ;;  %v813_v35 = vmul.f32 %v799_v61, %v799_v61  ;;  %v835_v33 = vsel %vm546_vm1, %v811_v36, 0.0  ;;  %1489 = vmatprep.subr.mxu1 %v1816_v22 }
 0x28e   :  { %v824_v16 = vadd.f32 %v823_v7, %v822_v63  ;;  %v837_v6 = vsel %vm546_vm1, %v812_v58, 0.0 }
 0x28f   :  { %v839_v44 = vsel %vm546_vm1, %v813_v35, 0.0 }
 0x290   :  { %v826_v17 = vadd.f32 %v825_v4, %v824_v16  ;;  %v853_v4 = vsub.s32 4, %v1940_v39 }
 0x292   :  { %v828_v2 = vadd.f32 %v827_v28, %v826_v17  ;;  %v871_v17 = vsub.s32 5, %v1940_v39 }
 0x294   :  { %v830_v31 = vadd.f32 %v829_v1, %v828_v2  ;;  %v872_v51 = vrot.slane %v2507_v38, %v871_v17 }
 0x296   :  { %v832_v11 = vadd.f32 %v831_v46, %v830_v31 }
 0x298   :  { %v834_v30 = vadd.f32 %v833_v60, %v832_v11 }
 0x29a   :  { %v836_v8 = vadd.f32 %v835_v33, %v834_v30 }
 0x29c   :  { %v838_v0 = vadd.f32 %v837_v6, %v836_v8 }
 0x29e   :  { %v840_v50 = vadd.f32 %v839_v44, %v838_v0 }
 0x2a0   :  { %v841_v19 = vrot.slane %v840_v50, 4 }
 0x2a2   :  { %v842_v9 = vadd.f32 %v841_v19, %v840_v50 }
 0x2a4   :  { %v843_v63 = vrot.slane %v842_v9, 2 }
 0x2a6   :  { %v844_v26 = vadd.f32 %v843_v63, %v842_v9 }
 0x2a8   :  { %v845_v52 = vrot.slane %v844_v26, 1 }
 0x2aa   :  { %v846_v7 = vadd.f32 %v845_v52, %v844_v26 }
 0x2ac   :  { %v847_v16 = vmul.f32 0.035714287, %v846_v7 }
 0x2ae   :  { %v848_v18 = vadd.f32 1e-05, %v847_v16 }
 0x2b0   :  { %1787 = vrsqrt.f32 %v848_v18 }
 0x2bd   :  { %v1788_v34 = vpop.eup %1787 }
 0x2be   :  { %v850_v28 = vmul.f32 %v2507_v38, %v1788_v34 }
 0x2c0   :  { %v854_v2 = vrot.slane %v850_v28, %v853_v4 }
 0x2c2   :  { %v857_v21 = vmul.f32 %v854_v2, %v2419_v53  ;;  %v856_v1 = vmul.f32 %v854_v2, %v2416_v13  ;;  %v859_v31 = vmul.f32 %v854_v2, %v2429_v23  ;;  %v858_v61 = vmul.f32 %v854_v2, %v2422_v14 }
 0x2c3   :  { %v861_v11 = vmul.f32 %v854_v2, %v2439_v25  ;;  %v860_v58 = vmul.f32 %v854_v2, %v2434_v3  ;;  %v863_v13 = vmul.f32 %v854_v2, %v2451_v55  ;;  %v862_v53 = vmul.f32 %v854_v2, %v2444_v56 }
 0x2c4   :  { %v2515_v36 = vadd.f32 %v872_v51, %v857_v21  ;;  %v874_v46 = vadd.f32 %v872_v51, %v856_v1  ;;  %v2520_v35 = vadd.f32 %v872_v51, %v859_v31  ;;  %v876_v33 = vadd.f32 %v872_v51, %v858_v61 }
 0x2c5   :  { %v855_v14 = vmul.f32 %v854_v2, %v2413_v27  ;;  %v2528_v25 = vadd.f32 %v872_v51, %v861_v11  ;;  %v878_v8 = vadd.f32 %v872_v51, %v860_v58  ;;  %v2532_v0 = vadd.f32 %v872_v51, %v863_v13 }
 0x2c6   :  { %v889_v60 = vmax.f32 %v2515_v36, 0.0  ;;  %v888_v30 = vmax.f32 %v874_v46, 0.0  ;;  %v891_v23 = vmax.f32 %v2520_v35, 0.0  ;;  %v890_v3 = vmax.f32 %v876_v33, 0.0 }
 0x2c7   :  { %v873_v6 = vadd.f32 %v872_v51, %v855_v14  ;;  %v880_v44 = vadd.f32 %v872_v51, %v862_v53  ;;  %v893_v55 = vmax.f32 %v2528_v25, 0.0  ;;  %v892_v50 = vmax.f32 %v878_v8, 0.0 }
 0x2c8   :  { %916 = vrot.lane.b32.xlu0 %v889_v60, %s1818_s26  ;;  %914 = vrot.lane.b32.xlu1 %v888_v30, %s1818_s26  ;;  %v865_v56 = vmul.f32 %v854_v2, %v2463_v62  ;;  %v864_v27 = vmul.f32 %v854_v2, %v2457_v10  ;;  %v867_v19 = vmul.f32 %v854_v2, %v2475_v48  ;;  %v895_v9 = vmax.f32 %v2532_v0, 0.0 }
 0x2c9   :  { %v894_v63 = vmax.f32 %v880_v44, 0.0  ;;  %v866_v7 = vmul.f32 %v854_v2, %v2469_v37  ;;  %v868_v48 = vmul.f32 %v854_v2, %v2481_v24  ;;  %v887_v34 = vmax.f32 %v873_v6, 0.0 }
 0x2ca   :  { %v2541_v26 = vadd.f32 %v872_v51, %v865_v56  ;;  %v882_v52 = vadd.f32 %v872_v51, %v864_v27  ;;  %v2546_v62 = vadd.f32 %v872_v51, %v867_v19 }
 0x2cb   :  { %v884_v18 = vadd.f32 %v872_v51, %v866_v7  ;;  %v886_v37 = vadd.f32 %v872_v51, %v868_v48 }
 0x2cc   :  { %920 = vrot.lane.b32.xlu0 %v891_v23, %s1818_s26  ;;  %918 = vrot.lane.b32.xlu1 %v890_v3, %s1818_s26  ;;  %v897_v10 = vmax.f32 %v2541_v26, 0.0  ;;  %v896_v16 = vmax.f32 %v882_v52, 0.0  ;;  %v899_v15 = vmax.f32 %v2546_v62, 0.0  ;;  %v976_v52 = vsub.s32 6, %v1940_v39 }
 0x2cd   :  { %v898_v4 = vmax.f32 %v884_v18, 0.0  ;;  %v900_v17 = vmax.f32 %v886_v37, 0.0 }
 0x2d0   :  { %924 = vrot.lane.b32.xlu0 %v893_v55, %s1818_s26  ;;  %922 = vrot.lane.b32.xlu1 %v892_v50, %s1818_s26 }
 0x2d4   :  { %928 = vrot.lane.b32.xlu0 %v895_v9, %s1818_s26  ;;  %926 = vrot.lane.b32.xlu1 %v894_v63, %s1818_s26 }
 0x2d8   :  { %932 = vrot.lane.b32.xlu0 %v897_v10, %s1818_s26  ;;  %930 = vrot.lane.b32.xlu1 %v896_v16, %s1818_s26 }
 0x2dc   :  { %936 = vrot.lane.b32.xlu0 %v899_v15, %s1818_s26  ;;  %934 = vrot.lane.b32.xlu1 %v898_v4, %s1818_s26 }
 0x2e0   :  { %938 = vrot.lane.b32.xlu1 %v900_v17, %s1818_s26 }
 0x33a   :  { %v915_v28 = vpop.permute.xlu1 %914  ;;  %v917_v2 = vpop.permute.xlu0 %916 }
 0x33b   :  { %v953_v24 = vsel %vm546_vm1, %v887_v34, %v915_v28  ;;  %v954_v51 = vsel %vm546_vm1, %v888_v30, %v917_v2 }
 0x33c   :  { %1722 = vmatmul.mubr.msk.f32.vlgmr.msra.gmra.mxu1 %vm978_vm3, %v953_v24 }
 0x33d   :  { %1724 = vmatprep.mubr.msk.f32.mxu1 %vm1817_vm2, %v1816_v22 }
 0x33e   :  { %v919_v21 = vpop.permute.xlu1 %918  ;;  %v921_v31 = vpop.permute.xlu0 %920 }
 0x33f   :  { %v955_v1 = vsel %vm546_vm1, %v889_v60, %v919_v21  ;;  %v956_v61 = vsel %vm546_vm1, %v890_v3, %v921_v31  ;;  %v1406_v31 = vld [vmem:[%s3007_s3 + $0x1d8] sm:$0xff] }
 0x340   :  { %1725 = vmatmul.mubr.msk.f32.gmra.mxu1 %vm978_vm3, %v954_v51 }
 0x341   :  { %1727 = vmatprep.mubr.msk.f32.mxu1 %vm1817_vm2, %v1816_v22 }
 0x342   :  { %v923_v36 = vpop.permute.xlu1 %922  ;;  %v925_v11 = vpop.permute.xlu0 %924 }
 0x343   :  { %v957_v46 = vsel %vm546_vm1, %v891_v23, %v923_v36  ;;  %v958_v58 = vsel %vm546_vm1, %v892_v50, %v925_v11  ;;  %v1405_v11 = vld [vmem:[%s3007_s3 + $0x1d0] sm:$0xff] }
 0x344   :  { %1728 = vmatmul.mubr.msk.f32.gmra.mxu1 %vm978_vm3, %v955_v1  ;;  %v1407_v1 = vld [vmem:[%s3007_s3 + $0x1e0] sm:$0xff] }
 0x345   :  { %1730 = vmatprep.mubr.msk.f32.mxu1 %vm1817_vm2, %v1816_v22  ;;  %1490 = vmatpush1.msra.mxu1 %v1407_v1 }
 0x346   :  { %v927_v60 = vpop.permute.xlu1 %926  ;;  %v929_v35 = vpop.permute.xlu0 %928  ;;  %1491 = vmatprep.subr.mxu1 %v1816_v22 }
 0x347   :  { %v959_v30 = vsel %vm546_vm1, %v893_v55, %v927_v60  ;;  %v960_v33 = vsel %vm546_vm1, %v894_v63, %v929_v35  ;;  %v1391_v60 = vld [vmem:[%s3007_s3 + $0x160] sm:$0xff]  ;;  %v1390_v35 = vld [vmem:[%s3007_s3 + $0x158] sm:$0xff]  ;;  %1492 = vmatpush1.msra.mxu1 %v1406_v31  ;;  %v1401_v31 = vld [vmem:[%s3007_s3 + $0x1b0] sm:$0xff] }
 0x348   :  { %1731 = vmatmul.mubr.msk.f32.gmra.mxu1 %vm978_vm3, %v956_v61  ;;  %1641 = vmatprep.subr.mxu0 %v1391_v60 }
 0x349   :  { %1733 = vmatprep.mubr.msk.f32.mxu1 %vm1817_vm2, %v1816_v22  ;;  %1493 = vmatprep.subr.mxu1 %v1816_v22 }
 0x34a   :  { %v931_v13 = vpop.permute.xlu1 %930  ;;  %v933_v14 = vpop.permute.xlu0 %932  ;;  %1494 = vmatpush1.msra.mxu1 %v1405_v11 }
 0x34b   :  { %v961_v53 = vsel %vm546_vm1, %v895_v9, %v931_v13  ;;  %v962_v23 = vsel %vm546_vm1, %v896_v16, %v933_v14  ;;  %1495 = vmatprep.subr.mxu1 %v1816_v22 }
 0x34c   :  { %1734 = vmatmul.mubr.msk.f32.gmra.mxu1 %vm978_vm3, %v957_v46 }
 0x34d   :  { %1736 = vmatprep.mubr.msk.f32.mxu1 %vm1817_vm2, %v1816_v22 }
 0x34e   :  { %v935_v3 = vpop.permute.xlu1 %934  ;;  %v937_v8 = vpop.permute.xlu0 %936 }
 0x34f   :  { %v963_v25 = vsel %vm546_vm1, %v897_v10, %v935_v3  ;;  %v964_v6 = vsel %vm546_vm1, %v898_v4, %v937_v8  ;;  %v2608_v10 = vrot.slane %v2507_v38, %v976_v52  ;;  %v1404_v8 = vld [vmem:[%s3007_s3 + $0x1c8] sm:$0xff] }
 0x350   :  { %1737 = vmatmul.mubr.msk.f32.gmra.mxu1 %vm978_vm3, %v958_v58 }
 0x351   :  { %1739 = vmatprep.mubr.msk.f32.mxu1 %vm1817_vm2, %v1816_v22  ;;  %1496 = vmatpush1.msra.mxu1 %v1404_v8 }
 0x352   :  { %v939_v0 = vpop.permute.xlu1 %938  ;;  %1497 = vmatprep.subr.mxu1 %v1816_v22 }
 0x353   :  { %v965_v44 = vsel %vm546_vm1, %v899_v15, %v939_v0 }
 0x354   :  { %1740 = vmatmul.mubr.msk.f32.gmra.mxu1 %vm978_vm3, %v959_v30  ;;  %v1375_v30 = vld [vmem:[%s3007_s3 + $0xe0] sm:$0xff] }
 0x355   :  { %1742 = vmatprep.mubr.msk.f32.mxu1 %vm1817_vm2, %v1816_v22  ;;  %1642 = vmatpush3.msra.mxu0 %v1375_v30 }
 0x356   :  { %1643 = vmatprep.subr.mxu0 %v1390_v35  ;;  %v1400_v35 = vld [vmem:[%s3007_s3 + $0x1a8] sm:$0xff] }
 0x358   :  { %1743 = vmatmul.mubr.msk.f32.gmra.mxu1 %vm978_vm3, %v960_v33 }
 0x359   :  { %1745 = vmatprep.mubr.msk.f32.mxu1 %vm1817_vm2, %v1816_v22 }
 0x35c   :  { %1746 = vmatmul.mubr.msk.f32.gmra.mxu1 %vm978_vm3, %v961_v53 }
 0x35d   :  { %1748 = vmatprep.mubr.msk.f32.mxu1 %vm1817_vm2, %v1816_v22 }
 0x360   :  { %1749 = vmatmul.mubr.msk.f32.gmra.mxu1 %vm978_vm3, %v962_v23  ;;  %v1374_v23 = vld [vmem:[%s3007_s3 + $0xd8] sm:$0xff] }
 0x361   :  { %1751 = vmatprep.mubr.msk.f32.mxu1 %vm1817_vm2, %v1816_v22  ;;  %1644 = vmatpush3.msra.mxu0 %v1374_v23 }
 0x364   :  { %1752 = vmatmul.mubr.msk.f32.gmra.mxu1 %vm978_vm3, %v963_v25 }
 0x365   :  { %1754 = vmatprep.mubr.msk.f32.mxu1 %vm1817_vm2, %v1816_v22 }
 0x368   :  { %1755 = vmatmul.mubr.msk.f32.gmra.mxu1 %vm978_vm3, %v964_v6  ;;  %v1389_v6 = vld [vmem:[%s3007_s3 + $0x150] sm:$0xff] }
 0x369   :  { %1757 = vmatprep.mubr.msk.f32.mxu1 %vm1817_vm2, %v1816_v22  ;;  %1645 = vmatprep.subr.mxu0 %v1389_v6  ;;  %v1399_v6 = vld [vmem:[%s3007_s3 + $0x1a0] sm:$0xff] }
 0x36c   :  { %1758 = vmatmul.mubr.msk.f32.gmra.mxu1 %vm978_vm3, %v965_v44 }
 0x3fc   :  { %v1084_v55 = vpop.f32.mrf.mxu1 }
 0x3fd   :  { %v2614_v15 = vadd.f32 %v1084_v55, %v2608_v10 }
 0x3fe   :  { %v1723_v50 = vpop.f32.mrf.mxu1 }
 0x3ff   :  { %v1148_v24 = vmul.f32 %v2614_v15, %v1944_v41  ;;  %v1373_v50 = vld [vmem:[%s3007_s3 + $0xd0] sm:$0xff] }
 0x400   :  { %v1089_v56 = vpop.f32.mrf.mxu1  ;;  %1646 = vmatpush3.msra.mxu0 %v1373_v50 }
 0x401   :  { %v2611_v18 = vadd.f32 %v1089_v56, %v2608_v10  ;;  %v1161_v33 = vsel %vm546_vm1, %v1148_v24, 0.0 }
 0x402   :  { %v1726_v27 = vpop.f32.mrf.mxu1 }
 0x403   :  { %v1149_v17 = vmul.f32 %v2611_v18, %v1942_v40 }
 0x404   :  { %v1094_v19 = vpop.f32.mrf.mxu1 }
 0x405   :  { %v2617_v4 = vadd.f32 %v1094_v19, %v2608_v10  ;;  %v1162_v61 = vsel %vm546_vm1, %v1149_v17, 0.0  ;;  %v1403_v19 = vld [vmem:[%s3007_s3 + $0x1c0] sm:$0xff] }
 0x406   :  { %v1729_v9 = vpop.f32.mrf.mxu1  ;;  %v1163_v3 = vadd.f32 %v1162_v61, %v1161_v33  ;;  %1498 = vmatpush1.msra.mxu1 %v1403_v19  ;;  %v1386_v61 = vld [vmem:[%s3007_s3 + $0x138] sm:$0xff]  ;;  %v1385_v33 = vld [vmem:[%s3007_s3 + $0x130] sm:$0xff] }
 0x407   :  { %v1150_v2 = vmul.f32 %v2617_v4, %v1955_v45  ;;  %v1388_v9 = vld [vmem:[%s3007_s3 + $0x148] sm:$0xff]  ;;  %1499 = vmatprep.subr.mxu1 %v1816_v22 }
 0x408   :  { %v1099_v63 = vpop.f32.mrf.mxu1  ;;  %1647 = vmatprep.subr.mxu0 %v1388_v9  ;;  %v1398_v9 = vld [vmem:[%s3007_s3 + $0x198] sm:$0xff] }
 0x409   :  { %v2622_v34 = vadd.f32 %v1099_v63, %v2608_v10  ;;  %v1164_v13 = vsel %vm546_vm1, %v1150_v2, 0.0  ;;  %v1371_v2 = vld [vmem:[%s3007_s3 + $0xc0] sm:$0xff] }
 0x40a   :  { %v1732_v26 = vpop.f32.mrf.mxu1  ;;  %v1165_v56 = vadd.f32 %v1164_v13, %v1163_v3  ;;  %v1369_v3 = vld [vmem:[%s3007_s3 + $0xb0] sm:$0xff] }
 0x40b   :  { %v1151_v36 = vmul.f32 %v2622_v34, %v1963_v49 }
 0x40c   :  { %v1104_v7 = vpop.f32.mrf.mxu1 }
 0x40d   :  { %v2629_v51 = vadd.f32 %v1104_v7, %v2608_v10  ;;  %v1166_v0 = vsel %vm546_vm1, %v1151_v36, 0.0  ;;  %v1372_v7 = vld [vmem:[%s3007_s3 + $0xc8] sm:$0xff] }
 0x40e   :  { %v1735_v62 = vpop.f32.mrf.mxu1  ;;  %1648 = vmatpush3.msra.mxu0 %v1372_v7 }
 0x40f   :  { %v1152_v53 = vmul.f32 %v2629_v51, %v1977_v59  ;;  %v1167_v62 = vadd.f32 %v1166_v0, %v1165_v56  ;;  %v1384_v0 = vld [vmem:[%s3007_s3 + $0x128] sm:$0xff] }
 0x410   :  { %v1109_v16 = vpop.f32.mrf.mxu1  ;;  %v1368_v56 = vld [vmem:[%s3007_s3 + $0xa8] sm:$0xff] }
 0x411   :  { %v2641_v46 = vadd.f32 %v1109_v16, %v2608_v10  ;;  %v1168_v63 = vsel %vm546_vm1, %v1152_v53, 0.0 }
 0x412   :  { %v1738_v48 = vpop.f32.mrf.mxu1 }
 0x413   :  { %v1153_v44 = vmul.f32 %v2641_v46, %v1986_v5  ;;  %v1402_v48 = vld [vmem:[%s3007_s3 + $0x1b8] sm:$0xff] }
 0x414   :  { %v1114_v37 = vpop.f32.mrf.mxu1  ;;  %1500 = vmatpush1.msra.mxu1 %v1402_v48 }
 0x415   :  { %v2661_v14 = vadd.f32 %v1114_v37, %v2608_v10  ;;  %v1387_v37 = vld [vmem:[%s3007_s3 + $0x140] sm:$0xff]  ;;  %v1170_v17 = vsel %vm546_vm1, %v1153_v44, 0.0  ;;  %1501 = vmatprep.subr.mxu1 %v1816_v22 }
 0x416   :  { %v1741_v28 = vpop.f32.mrf.mxu1  ;;  %1649 = vmatprep.subr.mxu0 %v1387_v37  ;;  %1502 = vmatpush1.msra.mxu1 %v1401_v31  ;;  %v1397_v37 = vld [vmem:[%s3007_s3 + $0x190] sm:$0xff] }
 0x417   :  { %v1154_v26 = vmul.f32 %v2661_v14, %v2011_v20  ;;  %1650 = vmatpush3.msra.mxu0 %v1371_v2  ;;  %1503 = vmatprep.subr.mxu1 %v1816_v22 }
 0x418   :  { %v1119_v21 = vpop.f32.mrf.mxu1  ;;  %1651 = vmatprep.subr.mxu0 %v1386_v61  ;;  %1504 = vmatpush1.msra.mxu1 %v1400_v35  ;;  %v1396_v61 = vld [vmem:[%s3007_s3 + $0x188] sm:$0xff] }
 0x419   :  { %v2677_v55 = vadd.f32 %v1119_v21, %v2608_v10  ;;  %v1169_v21 = vadd.f32 %v1168_v63, %v1167_v62  ;;  %v1172_v36 = vsel %vm546_vm1, %v1154_v26, 0.0  ;;  %1505 = vmatprep.subr.mxu1 %v1816_v22  ;;  %v1383_v63 = vld [vmem:[%s3007_s3 + $0x120] sm:$0xff] }
 0x41a   :  { %v1744_v58 = vpop.f32.mrf.mxu1  ;;  %1506 = vmatpush1.msra.mxu1 %v1399_v6  ;;  %v1367_v62 = vld [vmem:[%s3007_s3 + $0xa0] sm:$0xff] }
 0x41b   :  { %v1155_v28 = vmul.f32 %v2677_v55, %v2023_v32  ;;  %v1370_v58 = vld [vmem:[%s3007_s3 + $0xb8] sm:$0xff]  ;;  %v1171_v60 = vadd.f32 %v1170_v17, %v1169_v21  ;;  %1507 = vmatprep.subr.mxu1 %v1816_v22 }
 0x41c   :  { %v1124_v25 = vpop.f32.mrf.mxu1  ;;  %1652 = vmatpush3.msra.mxu0 %v1370_v58  ;;  %v1382_v17 = vld [vmem:[%s3007_s3 + $0x118] sm:$0xff]  ;;  %1508 = vmatpush1.msra.mxu1 %v1398_v9 }
 0x41d   :  { %v2693_v52 = vadd.f32 %v1124_v25, %v2608_v10  ;;  %v1174_v13 = vsel %vm546_vm1, %v1155_v28, 0.0  ;;  %v1173_v25 = vadd.f32 %v1172_v36, %v1171_v60  ;;  %1653 = vmatprep.subr.mxu0 %v1385_v33  ;;  %v1366_v21 = vld [vmem:[%s3007_s3 + $0x98] sm:$0xff]  ;;  %1509 = vmatprep.subr.mxu1 %v1816_v22  ;;  %v1381_v36 = vld [vmem:[%s3007_s3 + $0x110] sm:$0xff]  ;;  %v1395_v33 = vld [vmem:[%s3007_s3 + $0x180] sm:$0xff] }
 0x41e   :  { %v1747_v27 = vpop.f32.mrf.mxu1  ;;  %1654 = vmatpush3.msra.mxu0 %v1369_v3  ;;  %1510 = vmatpush1.msra.mxu1 %v1397_v37  ;;  %v1365_v60 = vld [vmem:[%s3007_s3 + $0x90] sm:$0xff] }
 0x41f   :  { %v1156_v11 = vmul.f32 %v2693_v52, %v2043_v57  ;;  %v1175_v27 = vadd.f32 %v1174_v13, %v1173_v25  ;;  %1655 = vmatprep.subr.mxu0 %v1384_v0  ;;  %1511 = vmatprep.subr.mxu1 %v1816_v22  ;;  %v1394_v25 = vld [vmem:[%s3007_s3 + $0x178] sm:$0xff]  ;;  %v1393_v0 = vld [vmem:[%s3007_s3 + $0x170] sm:$0xff] }
 0x420   :  { %v1129_v16 = vpop.f32.mrf.mxu1  ;;  %1656 = vmatpush3.msra.mxu0 %v1368_v56  ;;  %1512 = vmatpush1.msra.mxu1 %v1396_v61 }
 0x421   :  { %v2709_v24 = vadd.f32 %v1129_v16, %v2608_v10  ;;  %v1176_v44 = vsel %vm546_vm1, %v1156_v11, 0.0  ;;  %1657 = vmatprep.subr.mxu0 %v1383_v63  ;;  %1513 = vmatprep.subr.mxu1 %v1816_v22 }
 0x422   :  { %v1750_v1 = vpop.f32.mrf.mxu1  ;;  %v1177_v16 = vadd.f32 %v1176_v44, %v1175_v27  ;;  %1658 = vmatpush3.msra.mxu0 %v1367_v62  ;;  %1514 = vmatpush1.msra.mxu1 %v1395_v33 }
 0x423   :  { %v1157_v53 = vmul.f32 %v2709_v24, %v2056_v12  ;;  %1659 = vmatprep.subr.mxu0 %v1382_v17  ;;  %1515 = vmatprep.subr.mxu1 %v1816_v22 }
 0x424   :  { %v1134_v30 = vpop.f32.mrf.mxu1  ;;  %1660 = vmatpush3.msra.mxu0 %v1366_v21  ;;  %1516 = vmatpush1.msra.mxu1 %v1394_v25 }
 0x425   :  { %v2738_v23 = vadd.f32 %v1134_v30, %v2608_v10  ;;  %v1178_v26 = vsel %vm546_vm1, %v1157_v53, 0.0  ;;  %1661 = vmatprep.subr.mxu0 %v1381_v36  ;;  %v1364_v53 = vld [vmem:[%s3007_s3 + $0x88] sm:$0xff]  ;;  %1517 = vmatprep.subr.mxu1 %v1816_v22 }
 0x426   :  { %v1753_v8 = vpop.f32.mrf.mxu1  ;;  %v1179_v1 = vadd.f32 %v1178_v26, %v1177_v16  ;;  %1662 = vmatpush3.msra.mxu0 %v1365_v60  ;;  %1518 = vmatpush1.msra.mxu1 %v1393_v0 }
 0x427   :  { %v1158_v50 = vmul.f32 %v2738_v23, %v2073_v29  ;;  %1519 = vmatprep.subr.mxu1 %v1816_v22 }
 0x428   :  { %v1139_v19 = vpop.f32.mrf.mxu1 }
 0x429   :  { %v2765_v7 = vadd.f32 %v1139_v19, %v2608_v10  ;;  %v1180_v28 = vsel %vm546_vm1, %v1158_v50, 0.0 }
 0x42a   :  { %v1756_v48 = vpop.f32.mrf.mxu1  ;;  %v1181_v30 = vadd.f32 %v1180_v28, %v1179_v1 }
 0x42b   :  { %v1159_v2 = vmul.f32 %v2765_v7, %v2084_v54 }
 0x42c   :  { %v1144_v31 = vpop.f32.mrf.mxu1 }
 0x42d   :  { %v1182_v11 = vsel %vm546_vm1, %v1159_v2, 0.0  ;;  %v2792_v58 = vadd.f32 %v1144_v31, %v2608_v10  ;;  %v1380_v10 = vld [vmem:[%s3007_s3 + $0x108] sm:$0xff] }
 0x42e   :  { %v1759_v35 = vpop.f32.mrf.mxu1  ;;  %v1183_v3 = vadd.f32 %v1182_v11, %v1181_v30  ;;  %1663 = vmatprep.subr.mxu0 %v1380_v10 }
 0x42f   :  { %v1160_v13 = vmul.f32 %v2792_v58, %v2100_v47  ;;  %1664 = vmatpush3.msra.mxu0 %v1364_v53 }
 0x431   :  { %v1184_v8 = vsel %vm546_vm1, %v1160_v13, 0.0 }
 0x432   :  { %v1185_v6 = vadd.f32 %v1184_v8, %v1183_v3 }
 0x434   :  { %v1186_v44 = vrot.slane %v1185_v6, 4 }
 0x436   :  { %v1187_v50 = vadd.f32 %v1186_v44, %v1185_v6 }
 0x438   :  { %v1188_v56 = vrot.slane %v1187_v50, 2 }
 0x43a   :  { %v1189_v27 = vadd.f32 %v1188_v56, %v1187_v50 }
 0x43c   :  { %v1190_v19 = vrot.slane %v1189_v27, 1 }
 0x43e   :  { %v1191_v9 = vadd.f32 %v1190_v19, %v1189_v27 }
 0x440   :  { %v1192_v63 = vmul.f32 0.03846154, %v1191_v9 }
 0x442   :  { %v2821_v26 = vsub.f32 %v2614_v15, %v1192_v63  ;;  %v2824_v62 = vsub.f32 %v2611_v18, %v1192_v63  ;;  %v2827_v16 = vsub.f32 %v2617_v4, %v1192_v63  ;;  %v2830_v48 = vsub.f32 %v2622_v34, %v1192_v63 }
 0x443   :  { %v2837_v28 = vsub.f32 %v2629_v51, %v1192_v63  ;;  %v2842_v18 = vsub.f32 %v2641_v46, %v1192_v63  ;;  %v2847_v21 = vsub.f32 %v2661_v14, %v1192_v63  ;;  %v2853_v1 = vsub.f32 %v2677_v55, %v1192_v63 }
 0x444   :  { %v1206_v37 = vmul.f32 %v2821_v26, %v1944_v41  ;;  %v1207_v17 = vmul.f32 %v2824_v62, %v1942_v40  ;;  %v1208_v15 = vmul.f32 %v2827_v16, %v1955_v45  ;;  %v1209_v4 = vmul.f32 %v2830_v48, %v1963_v49 }
 0x445   :  { %v1210_v40 = vmul.f32 %v2837_v28, %v1977_v59  ;;  %v1211_v45 = vmul.f32 %v2842_v18, %v1986_v5  ;;  %v2859_v61 = vsub.f32 %v2693_v52, %v1192_v63  ;;  %v1212_v14 = vmul.f32 %v2847_v21, %v2011_v20 }
 0x446   :  { %v1219_v34 = vmul.f32 %v1206_v37, %v1206_v37  ;;  %v1220_v2 = vmul.f32 %v1207_v17, %v1207_v17  ;;  %v1221_v41 = vmul.f32 %v1208_v15, %v1208_v15  ;;  %v1222_v46 = vmul.f32 %v1209_v4, %v1209_v4 }
 0x447   :  { %v1223_v59 = vmul.f32 %v1210_v40, %v1210_v40  ;;  %v2865_v55 = vsub.f32 %v2709_v24, %v1192_v63  ;;  %v1213_v5 = vmul.f32 %v2853_v1, %v2023_v32  ;;  %v1224_v60 = vmul.f32 %v1211_v45, %v1211_v45 }
 0x448   :  { %v1232_v51 = vsel %vm546_vm1, %v1219_v34, 0.0  ;;  %v1233_v49 = vsel %vm546_vm1, %v1220_v2, 0.0  ;;  %v1235_v36 = vsel %vm546_vm1, %v1221_v41, 0.0  ;;  %v1237_v30 = vsel %vm546_vm1, %v1222_v46, 0.0 }
 0x449   :  { %v1234_v31 = vadd.f32 %v1233_v49, %v1232_v51  ;;  %v2871_v52 = vsub.f32 %v2738_v23, %v1192_v63  ;;  %v1214_v20 = vmul.f32 %v2859_v61, %v2043_v57  ;;  %v1225_v33 = vmul.f32 %v1212_v14, %v1212_v14 }
 0x44a   :  { %v1239_v10 = vsel %vm546_vm1, %v1223_v59, 0.0  ;;  %v2877_v24 = vsub.f32 %v2765_v7, %v1192_v63  ;;  %v1215_v32 = vmul.f32 %v2865_v55, %v2056_v12  ;;  %v1226_v53 = vmul.f32 %v1213_v5, %v1213_v5 }
 0x44b   :  { %v1236_v11 = vadd.f32 %v1235_v36, %v1234_v31  ;;  %v1241_v3 = vsel %vm546_vm1, %v1224_v60, 0.0  ;;  %v1205_v23 = vsub.f32 %v2792_v58, %v1192_v63  ;;  %v1216_v8 = vmul.f32 %v2871_v52, %v2073_v29  ;;  %v2899_v36 = vld [vmem:[%s3006_s2 + $0x8] sm:$0x3] }
 0x44c   :  { %v1227_v57 = vmul.f32 %v1214_v20, %v1214_v20  ;;  %v1243_v6 = vsel %vm546_vm1, %v1225_v33, 0.0  ;;  %v1217_v7 = vmul.f32 %v2877_v24, %v2084_v54  ;;  %v1228_v44 = vmul.f32 %v1215_v32, %v1215_v32 }
 0x44d   :  { %v1238_v35 = vadd.f32 %v1237_v30, %v1236_v11  ;;  %v1245_v50 = vsel %vm546_vm1, %v1226_v53, 0.0  ;;  %v1218_v56 = vmul.f32 %v1205_v23, %v2100_v47  ;;  %v1229_v27 = vmul.f32 %v1216_v8, %v1216_v8  ;;  %v1379_v30 = vld [vmem:[%s3007_s3 + $0x100] sm:$0xff] }
 0x44e   :  { %v1247_v19 = vsel %vm546_vm1, %v1227_v57, 0.0  ;;  %v1230_v9 = vmul.f32 %v1217_v7, %v1217_v7  ;;  %v1249_v29 = vsel %vm546_vm1, %v1228_v44, 0.0  ;;  %v1269_v14 = vsub.s32 7, %v1940_v39  ;;  %v1363_v39 = vld [vmem:[%s3007_s3 + $0x80] sm:$0xff]  ;;  %1665 = vmatprep.subr.mxu0 %v1379_v30 }
 0x44f   :  { %v1240_v13 = vadd.f32 %v1239_v10, %v1238_v35  ;;  %v1231_v37 = vmul.f32 %v1218_v56, %v1218_v56  ;;  %v1251_v17 = vsel %vm546_vm1, %v1229_v27, 0.0  ;;  %v2906_v60 = vrot.slane %v2899_v36, %v1947_v42  ;;  %v1392_v35 = vld [vmem:[%s3007_s3 + $0x168] sm:$0xff]  ;;  %1666 = vmatpush3.msra.mxu0 %v1363_v39 }
 0x450   :  { %v1253_v54 = vsel %vm546_vm1, %v1230_v9, 0.0  ;;  %1520 = vmatpush1.msra.mxu1 %v1392_v35 }
 0x451   :  { %v1242_v25 = vadd.f32 %v1241_v3, %v1240_v13  ;;  %v1255_v34 = vsel %vm546_vm1, %v1231_v37, 0.0  ;;  %v1362_v13 = vld [vmem:[%s3007_s3 + $0x78] sm:$0xff]  ;;  %v1377_v3 = vld [vmem:[%s3007_s3 + $0xf0] sm:$0xff]  ;;  %1545 = vmatprep.subr.mxu1 %v1816_v22 }
 0x453   :  { %v1244_v0 = vadd.f32 %v1243_v6, %v1242_v25 }
 0x455   :  { %v1246_v12 = vadd.f32 %v1245_v50, %v1244_v0  ;;  %v1410_v50 = vld [vmem:[%s3007_s3 + $0x1f8] sm:$0xff] }
 0x457   :  { %v1248_v58 = vadd.f32 %v1247_v19, %v1246_v12  ;;  %v1376_v12 = vld [vmem:[%s3007_s3 + $0xe8] sm:$0xff] }
 0x459   :  { %v1250_v63 = vadd.f32 %v1249_v29, %v1248_v58 }
 0x45b   :  { %v1252_v15 = vadd.f32 %v1251_v17, %v1250_v63  ;;  %v1360_v63 = vld [vmem:[%s3007_s3 + $0x68] sm:$0xff] }
 0x45d   :  { %v1254_v4 = vadd.f32 %v1253_v54, %v1252_v15 }
 0x45f   :  { %v1256_v2 = vadd.f32 %v1255_v34, %v1254_v4 }
 0x461   :  { %v1257_v40 = vrot.slane %v1256_v2, 4 }
 0x463   :  { %v1258_v47 = vadd.f32 %v1257_v40, %v1256_v2 }
 0x465   :  { %v1259_v41 = vrot.slane %v1258_v47, 2 }
 0x467   :  { %v1260_v51 = vadd.f32 %v1259_v41, %v1258_v47 }
 0x469   :  { %v1261_v45 = vrot.slane %v1260_v51, 1 }
 0x46b   :  { %v1262_v46 = vadd.f32 %v1261_v45, %v1260_v51 }
 0x46d   :  { %v1263_v49 = vmul.f32 0.03846154, %v1262_v46 }
 0x46f   :  { %v1264_v31 = vadd.f32 1e-05, %v1263_v49 }
 0x471   :  { %1789 = vrsqrt.f32 %v1264_v31 }
 0x47e   :  { %v1790_v59 = vpop.eup %1789 }
 0x47f   :  { %v1266_v11 = vmul.f32 %v2507_v38, %v1790_v59  ;;  %v1378_v38 = vld [vmem:[%s3007_s3 + $0xf8] sm:$0xff] }
 0x480   :  { %1667 = vmatprep.subr.mxu0 %v1378_v38 }
 0x481   :  { %v2902_v5 = vrot.slane %v1266_v11, %v1269_v14  ;;  %1668 = vmatpush3.msra.mxu0 %v1362_v13 }
 0x482   :  { %1669 = vmatprep.subr.mxu0 %v1377_v3 }
 0x483   :  { %v1283_v42 = vmul.f32 %v2902_v5, %v1205_v23  ;;  %v1273_v20 = vmul.f32 %v2902_v5, %v2827_v16  ;;  %v1277_v33 = vmul.f32 %v2902_v5, %v2847_v21  ;;  %v1272_v10 = vmul.f32 %v2902_v5, %v2824_v62  ;;  %v1411_v62 = vld [vmem:[%s3007_s3 + $0x200] sm:$0xff] }
 0x484   :  { %v1276_v32 = vmul.f32 %v2902_v5, %v2842_v18  ;;  %v1280_v53 = vmul.f32 %v2902_v5, %v2865_v55  ;;  %v1274_v16 = vmul.f32 %v2902_v5, %v2830_v48  ;;  %v1278_v21 = vmul.f32 %v2902_v5, %v2853_v1  ;;  %v1361_v1 = vld [vmem:[%s3007_s3 + $0x70] sm:$0xff]  ;;  %1546 = vmatpush2.msra.mxu1 %v1411_v62 }
 0x485   :  { %v1300_v18 = vadd.f32 %v2906_v60, %v1283_v42  ;;  %v1290_v25 = vadd.f32 %v2906_v60, %v1273_v20  ;;  %v1294_v55 = vadd.f32 %v2906_v60, %v1277_v33  ;;  %v1289_v48 = vadd.f32 %v2906_v60, %v1272_v10  ;;  %1547 = vmatprep.subr.mxu1 %v1816_v22 }
 0x486   :  { %v1293_v23 = vadd.f32 %v2906_v60, %v1276_v32  ;;  %v1291_v8 = vadd.f32 %v2906_v60, %v1274_v16  ;;  %v1295_v57 = vadd.f32 %v2906_v60, %v1278_v21  ;;  %v1297_v27 = vadd.f32 %v2906_v60, %v1280_v53  ;;  %1670 = vmatpush3.msra.mxu0 %v1361_v1 }
 0x487   :  { %v1313_v6 = vmax.f32 %v1300_v18, 0.0  ;;  %v1303_v0 = vmax.f32 %v1290_v25, 0.0  ;;  %v1307_v7 = vmax.f32 %v1294_v55, 0.0  ;;  %v1302_v44 = vmax.f32 %v1289_v48, 0.0  ;;  %1548 = vmatpush2.msra.mxu1 %v1410_v50  ;;  %1671 = vmatprep.subr.mxu0 %v1376_v12 }
 0x488   :  { %v1306_v56 = vmax.f32 %v1293_v23, 0.0  ;;  %v1304_v58 = vmax.f32 %v1291_v8, 0.0  ;;  %v1282_v9 = vmul.f32 %v2902_v5, %v2877_v24  ;;  %v1271_v29 = vmul.f32 %v2902_v5, %v2821_v26  ;;  %v1409_v24 = vld [vmem:[%s3007_s3 + $0x1f0] sm:$0xff]  ;;  %1549 = vmatprep.subr.mxu1 %v1816_v22  ;;  %1672 = vmatpush3.msra.mxu0 %v1360_v63 }
 0x489   :  { %1601 = vmatprep.mubr.msk.f32.mxu1 %vm546_vm1, %v1313_v6  ;;  %v1775_v19 = vpack.i.bf16 %v1303_v0, %v1307_v7  ;;  %v1308_v17 = vmax.f32 %v1295_v57, 0.0  ;;  %v1281_v15 = vmul.f32 %v2902_v5, %v2871_v52  ;;  %v1279_v54 = vmul.f32 %v2902_v5, %v2859_v61  ;;  %v1408_v52 = vld [vmem:[%s3007_s3 + $0x1e8] sm:$0xff]  ;;  %1550 = vmatpush2.msra.mxu1 %v1409_v24  ;;  %s1821_s3 = smov [#allocation2]  }
 0x48a   :  { %v1770_v37 = vpack.i.bf16 %v1302_v44, %v1306_v56  ;;  %v1288_v26 = vadd.f32 %v2906_v60, %v1271_v29  ;;  %v1275_v61 = vmul.f32 %v2902_v5, %v2837_v28  ;;  %v1310_v34 = vmax.f32 %v1297_v27, 0.0  ;;  %1551 = vmatprep.subr.mxu1 %v1816_v22 }
 0x48b   :  { %1776 = vrot.lane.b32.xlu1 %v1775_v19, %s1819_s23  ;;  %v1296_v4 = vadd.f32 %v2906_v60, %v1279_v54  ;;  %v1299_v2 = vadd.f32 %v2906_v60, %v1282_v9  ;;  %v1780_v40 = vpack.i.bf16 %v1304_v58, %v1308_v17  ;;  %v1298_v47 = vadd.f32 %v2906_v60, %v1281_v15 }
 0x48c   :  { %1771 = vrot.lane.b32.xlu0 %v1770_v37, %s1818_s26  ;;  %v1292_v41 = vadd.f32 %v2906_v60, %v1275_v61  ;;  %1552 = vmatpush2.msra.mxu1 %v1408_v52  ;;  %v1301_v14 = vmax.f32 %v1288_v26, 0.0  ;;  %v1415_v18 = vrot.slane %v2899_v36, %v1950_v43 }
 0x48d   :  { %v1312_v28 = vmax.f32 %v1299_v2, 0.0  ;;  %v1311_v51 = vmax.f32 %v1298_v47, 0.0  ;;  %v1309_v42 = vmax.f32 %v1296_v4, 0.0 }
 0x48e   :  { %v1305_v59 = vmax.f32 %v1292_v41, 0.0 }
 0x48f   :  { %1339 = vrot.lane.b32.xlu1 %v1310_v34, %s1818_s26  ;;  %s1566_s26 = sshll.u32 %s1821_s3, 4  ;;  %s1567_s26 = int_to_ptr.vmem [resolvable:$true] %s1566_s26 }
 0x490   :  { %1781 = vrot.lane.b32.xlu0 %v1780_v40, %s1820_s1  ;;  %s1792_s25 = scalar_lea.vmem %s1567_s26, 128  ;;  %p1797_p1 = scmp.lt.s32.totalorder %s1567_s26, %s1567_s26 }
 0x491   :  { %p1793_p0 = scmp.ne.s32.totalorder %s1567_s26, %s1792_s25  ;;  %p1798_p2 = scmp.lt.s32.totalorder %s1792_s25, %s1792_s25 }
 0x493   :  { %1347 = vrot.lane.b32.xlu1 %v1312_v28, %s1820_s1  ;;  %p1799_p3 = por %p1798_p2, %p1797_p1 }
 0x494   :  { %1343 = vrot.lane.b32.xlu0 %v1311_v51, %s1819_s23 }
 0x495   :  { %p1800_p4 = pnand %p1799_p3, %p1793_p0 }
 0x4fd   :  { %v1777_v45 = vpop.permute.xlu1 %1776 }
 0x4fe   :  { %v1772_v46 = vpop.permute.xlu0 %1771  ;;  %v1779_v11 = vunpack.i.h.bf16 %v1777_v45  ;;  %v1778_v5 = vunpack.i.l.bf16 %v1777_v45 }
 0x4ff   :  { %v1774_v49 = vunpack.i.h.bf16 %v1772_v46  ;;  %v1773_v31 = vunpack.i.l.bf16 %v1772_v46 }
 0x501   :  { %v1350_v60 = vsel %vm546_vm1, %v1301_v14, %v1774_v49  ;;  %v1340_v22 = vpop.permute.xlu1 %1339  ;;  %v1354_v30 = vsel %vm546_vm1, %v1305_v59, %v1773_v31 }
 0x502   :  { %v1782_v39 = vpop.permute.xlu0 %1781  ;;  %v1355_v20 = vsel %vm978_vm3, %v1354_v30, %v1778_v5  ;;  %v1351_v33 = vsel %vm978_vm3, %v1350_v60, %v1779_v11  ;;  %v1357_v53 = vsel %vm546_vm1, %v1309_v42, %v1340_v22 }
 0x503   :  { %v1784_v35 = vunpack.i.h.bf16 %v1782_v39  ;;  %v1783_v38 = vunpack.i.l.bf16 %v1782_v39 }
 0x505   :  { %v1348_v10 = vpop.permute.xlu1 %1347  ;;  %v1356_v13 = vsel %vm1352_vm4, %v1355_v20, %v1783_v38  ;;  %v1353_v32 = vsel %vm1352_vm4, %v1351_v33, %v1784_v35 }
 0x506   :  { %v1344_v16 = vpop.permute.xlu0 %1343  ;;  %1483 = vmatprep.mubr.f32.mxu0 %v1356_v13 }
 0x507   :  { %v1358_v21 = vsel %vm978_vm3, %v1357_v53, %v1344_v16  ;;  %1484 = vmatmul.mubr.f32.vlgmr.msra.gmra.mxu0 %v1353_v32 }
 0x508   :  { %v1359_v62 = vsel %vm1352_vm4, %v1358_v21, %v1348_v10 }
 0x509   :  { %1554 = vmatmul.mubr.f32.vlgmr.msra.gmra.mxu1 %v1359_v62 }
 0x5c7   :  { %v1673_v3 = vpop.f32.mrf.mxu0 }
 0x5c9   :  { %v1674_v25 = vpop.f32.mrf.mxu0  ;;  %v1555_v55 = vpop.f32.mrf.mxu1 }
 0x5ca   :  { %v1675_v48 = vadd.f32 %v1674_v25, %v1673_v3 }
 0x5cb   :  { %v1557_v1 = vpop.f32.mrf.mxu1 }
 0x5cc   :  { %v1486_v23 = vadd.f32 %v1675_v48, %v1415_v18 }
 0x5ce   :  { %v1556_v8 = vadd.f32 %v1555_v55, %v1486_v23 }
 0x5d0   :  { %1559 = vst.msk [vmem:[#allocation2] sm:$0xff] %vm546_vm1, %v1556_v8 }
 0x5d1   :  { %1803 = shalt.err (!%p1800_p4)
}
 0x5d2   :  { %1569 = dma.vmem_to_hbm [thread:$0]  %s1567_s26, 128, %s3008_s4, [#allocation3]  }
 0x5d3   :  { %1812 = dma.done.wait [#allocation3], 128  }
 0x5d4   :  { %1813 = vsyncadd [#allocation3], 4294967168 }
 0x5d5   :  { %1573 = vsyncpa [#allocation3], 1 }

</bundles_post_ra>
